<compile_context>
chip_gen: v7x
topology: tpu7x:2x2x1
jax: 0.10.0
libtpu: 0.0.40
codegen_flags: <defaults>
</compile_context>

<pallas_src>
import functools
import math

import jax
import jax.numpy as jnp
from jax import lax
from jax.experimental import pallas as pl
from jax.experimental.pallas import tpu as pltpu


def _round_up(x, m):
    return ((x + m - 1) // m) * m


# --------------------------------------------------------------------------
# Fully fused small-N kernel:  out = log_softmax(A @ (relu(A@X@W1+b1) @ W2) + b2)
# --------------------------------------------------------------------------
def gcn_fused_kernel(a_ref, x_ref, w1_ref, b1_ref, w2_ref, b2_ref, o_ref,
                     *, out_dim):
    a = a_ref[...]
    ax = jnp.dot(a, x_ref[...], preferred_element_type=jnp.float32)
    h = jnp.dot(ax.astype(jnp.bfloat16), w1_ref[...],
                preferred_element_type=jnp.float32)
    h = jnp.maximum(h + b1_ref[...], 0.0)
    # F.dropout(training=False) is the identity at inference time.
    hw = jnp.dot(h.astype(jnp.bfloat16), w2_ref[...],
                 preferred_element_type=jnp.float32)
    z = jnp.dot(a, hw.astype(jnp.bfloat16),
                preferred_element_type=jnp.float32) + b2_ref[...]
    # Mask padded logit lanes so they don't perturb the normalizer.
    col = lax.broadcasted_iota(jnp.int32, z.shape, 1)
    z = jnp.where(col < out_dim, z, -jnp.inf)
    m = jnp.max(z, axis=1, keepdims=True)
    lse = jnp.log(jnp.sum(jnp.exp(z - m), axis=1, keepdims=True)) + m
    o_ref[...] = z - lse


def _gcn_fused(a, x, w1, b1, w2, b2, *, out_dim):
    n_pad = a.shape[0]
    in_p = x.shape[1]
    hid_p = w1.shape[1]
    out_p = w2.shape[1]

    flops = (2 * n_pad * n_pad * in_p + 2 * n_pad * in_p * hid_p
             + 2 * n_pad * hid_p * out_p + 2 * n_pad * n_pad * out_p)
    bytes_accessed = (a.size * 2 + x.size * 2 + w1.size * 2 + w2.size * 2
                      + b1.size * 4 + b2.size * 4 + n_pad * out_p * 4)

    kernel = functools.partial(gcn_fused_kernel, out_dim=out_dim)
    return pl.pallas_call(
        kernel,
        out_shape=jax.ShapeDtypeStruct((n_pad, out_p), jnp.float32),
        compiler_params=pltpu.CompilerParams(
            vmem_limit_bytes=48 * 1024 * 1024),
        cost_estimate=pl.CostEstimate(
            flops=flops, transcendentals=n_pad * out_p,
            bytes_accessed=bytes_accessed),
    )(a, x, w1, b1, w2, b2)


# --------------------------------------------------------------------------
# Tiled layer 1:  HW = relu( A_hat @ X @ W1 + b1 ) @ W2
# --------------------------------------------------------------------------
def gcn_layer1_kernel(a_ref, x_ref, w1_ref, b1_ref, w2_ref, hw_ref, acc_ref,
                      *, tk, x_resident):
    k = pl.program_id(1)

    @pl.when(k == 0)
    def _():
        acc_ref[...] = jnp.zeros_like(acc_ref)

    if x_resident:
        x_blk = x_ref[pl.ds(pl.multiple_of(k * tk, 128), tk), :]
    else:
        x_blk = x_ref[...]
    # Accumulate (A @ X) over column tiles of A.  bf16 MXU, f32 accumulation.
    acc_ref[...] += jnp.dot(a_ref[...], x_blk,
                            preferred_element_type=jnp.float32)

    @pl.when(k == pl.num_programs(1) - 1)
    def _():
        h = jnp.dot(acc_ref[...].astype(jnp.bfloat16), w1_ref[...],
                    preferred_element_type=jnp.float32)
        h = jnp.maximum(h + b1_ref[...], 0.0)
        # F.dropout(training=False) is the identity at inference time.
        # Fuse the layer-2 W2 projection here (runs once per row tile).
        hw = jnp.dot(h.astype(jnp.bfloat16), w2_ref[...],
                     preferred_element_type=jnp.float32)
        hw_ref[...] = hw.astype(hw_ref.dtype)


def _gcn_layer1(a, x, w1, b1, w2, *, tm, tk):
    n_pad = a.shape[0]
    in_p = x.shape[1]
    hid_p = w1.shape[1]
    out_p = w2.shape[1]
    grid = (n_pad // tm, n_pad // tk)
    row_tiles = grid[0]

    # Keep X fully VMEM-resident (DMAed once) when it fits a small budget.
    x_resident = 2 * n_pad * in_p * 2 <= (8 << 20)
    x_spec = (pl.BlockSpec((n_pad, in_p), lambda i, k: (0, 0)) if x_resident
              else pl.BlockSpec((tk, in_p), lambda i, k: (k, 0)))

    flops = (2 * n_pad * n_pad * in_p + 2 * n_pad * in_p * hid_p
             + 2 * n_pad * hid_p * out_p)
    x_reads = 1 if x_resident else row_tiles
    bytes_accessed = (a.size * 2 + x.size * 2 * x_reads
                      + w1.size * 2 + w2.size * 2 + b1.size * 4
                      + n_pad * out_p * 2)

    vmem_bytes = (2 * tm * tk * 2
                  + (2 * n_pad * in_p * 2 if x_resident else 2 * tk * in_p * 2)
                  + 2 * (in_p * hid_p + hid_p * out_p) * 2
                  + 2 * (hid_p + out_p) * 4
                  + 2 * tm * out_p * 2
                  + tm * in_p * 4
                  + (4 << 20))
    vmem_limit = int(min(max(vmem_bytes, 16 << 20), 48 << 20))

    kernel = functools.partial(gcn_layer1_kernel, tk=tk, x_resident=x_resident)
    return pl.pallas_call(
        kernel,
        out_shape=jax.ShapeDtypeStruct((n_pad, out_p), jnp.bfloat16),
        grid_spec=pltpu.PrefetchScalarGridSpec(
            num_scalar_prefetch=0,
            grid=grid,
            in_specs=[
                pl.BlockSpec((tm, tk), lambda i, k: (i, k)),        # A tile
                x_spec,                                             # X
                pl.BlockSpec((in_p, hid_p), lambda i, k: (0, 0)),   # W1
                pl.BlockSpec((1, hid_p), lambda i, k: (0, 0)),      # b1
                pl.BlockSpec((hid_p, out_p), lambda i, k: (0, 0)),  # W2
            ],
            out_specs=pl.BlockSpec((tm, out_p), lambda i, k: (i, 0)),
            scratch_shapes=[pltpu.VMEM((tm, in_p), jnp.float32)],
        ),
        compiler_params=pltpu.CompilerParams(
            dimension_semantics=("parallel", "arbitrary"),
            vmem_limit_bytes=vmem_limit),
        cost_estimate=pl.CostEstimate(
            flops=flops, transcendentals=0, bytes_accessed=bytes_accessed),
    )(a, x, w1, b1, w2)


# --------------------------------------------------------------------------
# Tiled layer 2:  out = log_softmax( A_hat @ HW + b2 , axis=1 )
# --------------------------------------------------------------------------
def gcn_layer2_kernel(a_ref, hw_ref, b2_ref, o_ref, acc_ref,
                      *, tk, out_dim, hw_resident):
    k = pl.program_id(1)

    @pl.when(k == 0)
    def _():
        acc_ref[...] = jnp.zeros_like(acc_ref)

    if hw_resident:
        hw_blk = hw_ref[pl.ds(pl.multiple_of(k * tk, 128), tk), :]
    else:
        hw_blk = hw_ref[...]
    acc_ref[...] += jnp.dot(a_ref[...], hw_blk,
                            preferred_element_type=jnp.float32)

    @pl.when(k == pl.num_programs(1) - 1)
    def _():
        z = acc_ref[...] + b2_ref[...]
        col = lax.broadcasted_iota(jnp.int32, z.shape, 1)
        z = jnp.where(col < out_dim, z, -jnp.inf)
        m = jnp.max(z, axis=1, keepdims=True)
        lse = jnp.log(jnp.sum(jnp.exp(z - m), axis=1, keepdims=True)) + m
        o_ref[...] = z - lse


def _gcn_layer2(a, hw, b2, *, out_dim, tm, tk):
    n_pad = a.shape[0]
    out_p = hw.shape[1]
    grid = (n_pad // tm, n_pad // tk)
    row_tiles = grid[0]

    hw_resident = 2 * n_pad * out_p * 2 <= (8 << 20)
    hw_spec = (pl.BlockSpec((n_pad, out_p), lambda i, k: (0, 0)) if hw_resident
               else pl.BlockSpec((tk, out_p), lambda i, k: (k, 0)))

    flops = 2 * n_pad * n_pad * out_p
    hw_reads = 1 if hw_resident else row_tiles
    bytes_accessed = (a.size * 2 + hw.size * 2 * hw_reads + b2.size * 4
                      + n_pad * out_p * 4)

    vmem_bytes = (2 * tm * tk * 2
                  + (2 * n_pad * out_p * 2 if hw_resident
                     else 2 * tk * out_p * 2)
                  + 2 * out_p * 4
                  + 2 * tm * out_p * 4
                  + tm * out_p * 4
                  + (4 << 20))
    vmem_limit = int(min(max(vmem_bytes, 16 << 20), 48 << 20))

    kernel = functools.partial(gcn_layer2_kernel, tk=tk, out_dim=out_dim,
                               hw_resident=hw_resident)
    return pl.pallas_call(
        kernel,
        out_shape=jax.ShapeDtypeStruct((n_pad, out_p), jnp.float32),
        grid_spec=pltpu.PrefetchScalarGridSpec(
            num_scalar_prefetch=0,
            grid=grid,
            in_specs=[
                pl.BlockSpec((tm, tk), lambda i, k: (i, k)),   # A tile
                hw_spec,                                       # HW
                pl.BlockSpec((1, out_p), lambda i, k: (0, 0)),  # b2
            ],
            out_specs=pl.BlockSpec((tm, out_p), lambda i, k: (i, 0)),
            scratch_shapes=[pltpu.VMEM((tm, out_p), jnp.float32)],
        ),
        compiler_params=pltpu.CompilerParams(
            dimension_semantics=("parallel", "arbitrary"),
            vmem_limit_bytes=vmem_limit),
        cost_estimate=pl.CostEstimate(
            flops=flops, transcendentals=n_pad * out_p,
            bytes_accessed=bytes_accessed),
    )(a, hw, b2)


# --------------------------------------------------------------------------
# Wrapper: padding / dtype plumbing + dispatch (fused vs. tiled).
# --------------------------------------------------------------------------
def gcn_forward(a_hat, x, w1, b1, w2, b2, *, row_tile=512, k_tile=512,
                fused_max_nodes=2048, force_tiled=False):
    n, in_dim = x.shape
    hidden = w1.shape[1]
    out_dim = w2.shape[1]

    lane = 128
    in_p = _round_up(in_dim, lane)
    hid_p = _round_up(hidden, lane)
    out_p = _round_up(out_dim, lane)
    n_base = _round_up(max(n, 1), lane)

    use_fused = (not force_tiled) and (n_base <= fused_max_nodes)

    if use_fused:
        n_pad = n_base
        tm = tk = None
    else:
        assert row_tile % lane == 0 and k_tile % lane == 0, \
            "tiles must be multiples of 128"
        tm = min(row_tile, n_base)
        tk = min(k_tile, n_base)
        # Keep >= 2 row tiles so both v7x TensorCores get work.
        while n_base // tm < 2 and tm > lane:
            tm //= 2
        # Pad so the grid never truncates rows/columns of A (lcm, not max).
        n_pad = _round_up(n_base, math.lcm(tm, tk))
        assert n_pad % tm == 0 and n_pad % tk == 0

    # bf16 operands for the MXU-heavy path, f32 biases for the VPU epilogue.
    a_p = jnp.zeros((n_pad, n_pad), jnp.bfloat16).at[:n, :n].set(
        a_hat.astype(jnp.bfloat16))
    x_p = jnp.zeros((n_pad, in_p), jnp.bfloat16).at[:n, :in_dim].set(
        x.astype(jnp.bfloat16))
    w1_p = jnp.zeros((in_p, hid_p), jnp.bfloat16).at[:in_dim, :hidden].set(
        w1.astype(jnp.bfloat16))
    b1_p = jnp.zeros((1, hid_p), jnp.float32).at[:, :hidden].set(
        b1.reshape(1, -1).astype(jnp.float32))
    w2_p = jnp.zeros((hid_p, out_p), jnp.bfloat16).at[:hidden, :out_dim].set(
        w2.astype(jnp.bfloat16))
    b2_p = jnp.zeros((1, out_p), jnp.float32).at[:, :out_dim].set(
        b2.reshape(1, -1).astype(jnp.float32))

    if use_fused:
        z = _gcn_fused(a_p, x_p, w1_p, b1_p, w2_p, b2_p, out_dim=out_dim)
    else:
        hw = _gcn_layer1(a_p, x_p, w1_p, b1_p, w2_p, tm=tm, tk=tk)
        z = _gcn_layer2(a_p, hw, b2_p, out_dim=out_dim, tm=tm, tk=tk)
    return z[:n, :out_dim]


def build_norm_adj(edge_index, num_nodes):
    """Dense symmetric-normalized adjacency with self-loops (PyG gcn_norm)."""
    src = edge_index[0]
    dst = edge_index[1]
    a = jnp.zeros((num_nodes, num_nodes), jnp.float32)
    # message flows source -> target:  out[i] += norm * (x[j] @ W)  for j -> i
    a = a.at[dst, src].add(1.0)
    a = a + jnp.eye(num_nodes, dtype=jnp.float32)
    deg = jnp.sum(a, axis=1)
    d_inv_sqrt = jnp.where(deg > 0, 1.0 / jnp.sqrt(deg), 0.0)
    return d_inv_sqrt[:, None] * a * d_inv_sqrt[None, :]


def gcn_reference(a_hat, x, w1, b1, w2, b2):
    """Pure-JAX f32 reference for correctness checking."""
    h = jnp.maximum(a_hat @ (x @ w1) + b1.reshape(1, -1), 0.0)
    z = a_hat @ (h @ w2) + b2.reshape(1, -1)
    return jax.nn.log_softmax(z, axis=1)


if __name__ == "__main__":
    # Small shapes consistent with the module's forward (node classification).
    N, IN_DIM, HIDDEN_DIM, OUT_DIM, E = 256, 16, 32, 8, 1024

    key = jax.random.PRNGKey(0)
    k_x, k_src, k_dst, k_w1, k_b1, k_w2, k_b2 = jax.random.split(key, 7)

    x = jax.random.normal(k_x, (N, IN_DIM), dtype=jnp.float32)
    src = jax.random.randint(k_src, (E,), 0, N)
    dst = jax.random.randint(k_dst, (E,), 0, N)
    edge_index = jnp.stack([src, dst], axis=0)

    w1 = jax.random.normal(k_w1, (IN_DIM, HIDDEN_DIM), dtype=jnp.float32) * 0.1
    b1 = jax.random.normal(k_b1, (HIDDEN_DIM,), dtype=jnp.float32) * 0.1
    w2 = jax.random.normal(k_w2, (HIDDEN_DIM, OUT_DIM), dtype=jnp.float32) * 0.1
    b2 = jax.random.normal(k_b2, (OUT_DIM,), dtype=jnp.float32) * 0.1

    a_hat = build_norm_adj(edge_index, N)
    ref = gcn_reference(a_hat, x, w1, b1, w2, b2)

    # 1) Fused small-N fast path (default dispatch for N=256).
    out_fused = jax.block_until_ready(gcn_forward(a_hat, x, w1, b1, w2, b2))
    assert out_fused.shape == (N, OUT_DIM)
    row_sums = jnp.exp(out_fused).sum(axis=1)
    assert bool(jnp.all(jnp.abs(row_sums - 1.0) < 1e-3))
    assert bool(jnp.max(jnp.abs(out_fused - ref)) < 1.5e-1)  # bf16 MXU tol

    # 2) Tiled two-call path (forced, small tiles -> 2x2 grid, resident X/HW).
    out_tiled = jax.block_until_ready(
        gcn_forward(a_hat, x, w1, b1, w2, b2, force_tiled=True,
                    row_tile=128, k_tile=128))
    assert out_tiled.shape == (N, OUT_DIM)
    assert bool(jnp.max(jnp.abs(out_tiled - ref)) < 1.5e-1)

    print("KERNEL_OK")
</pallas_src>

<mosaic_0001>
module attributes {stable_mosaic.version = 11 : i64} {
  func.func @gcn_fused_kernel(%arg0: memref<256x256xbf16, #tpu.memory_space<vmem>>, %arg1: memref<256x128xbf16, #tpu.memory_space<vmem>>, %arg2: memref<128x128xbf16, #tpu.memory_space<vmem>>, %arg3: memref<1x128xf32, #tpu.memory_space<vmem>>, %arg4: memref<128x128xbf16, #tpu.memory_space<vmem>>, %arg5: memref<1x128xf32, #tpu.memory_space<vmem>>, %arg6: memref<256x128xf32, #tpu.memory_space<vmem>>) attributes {dimension_semantics = [], scalar_prefetch = 0 : i64, scratch_operands = 0 : i64, tpu.core_type = #tpu.core_type<tc>} {
    %c0 = arith.constant 0 : index
    %c0_0 = arith.constant 0 : index
    %0 = vector.load %arg0[%c0, %c0_0] : memref<256x256xbf16, #tpu.memory_space<vmem>>, vector<256x256xbf16>
    %c0_1 = arith.constant 0 : index
    %c0_2 = arith.constant 0 : index
    %1 = vector.load %arg1[%c0_1, %c0_2] : memref<256x128xbf16, #tpu.memory_space<vmem>>, vector<256x128xbf16>
    %cst = arith.constant dense<0.000000e+00> : vector<256x128xf32>
    %2 = tpu.matmul %0, %1, %cst {dimension_numbers = #tpu.dot_dimension_numbers<[1], [0], [0], [1], [0, 0, 1, 1], [], []>} : vector<256x256xbf16>, vector<256x128xbf16>, vector<256x128xf32> -> vector<256x128xf32>
    %3 = arith.truncf %2 : vector<256x128xf32> to vector<256x128xbf16>
    %c0_3 = arith.constant 0 : index
    %c0_4 = arith.constant 0 : index
    %4 = vector.load %arg2[%c0_3, %c0_4] : memref<128x128xbf16, #tpu.memory_space<vmem>>, vector<128x128xbf16>
    %cst_5 = arith.constant dense<0.000000e+00> : vector<256x128xf32>
    %5 = tpu.matmul %3, %4, %cst_5 {dimension_numbers = #tpu.dot_dimension_numbers<[1], [0], [0], [1], [0, 0, 1, 1], [], []>} : vector<256x128xbf16>, vector<128x128xbf16>, vector<256x128xf32> -> vector<256x128xf32>
    %c0_6 = arith.constant 0 : index
    %c0_7 = arith.constant 0 : index
    %6 = vector.load %arg3[%c0_6, %c0_7] : memref<1x128xf32, #tpu.memory_space<vmem>>, vector<1x128xf32>
    %7 = vector.broadcast %6 : vector<1x128xf32> to vector<256x128xf32>
    %8 = arith.addf %5, %7 : vector<256x128xf32>
    %cst_8 = arith.constant 0.000000e+00 : f32
    %9 = vector.broadcast %cst_8 : f32 to vector<256x128xf32>
    %10 = arith.maximumf %8, %9 : vector<256x128xf32>
    %11 = arith.truncf %10 : vector<256x128xf32> to vector<256x128xbf16>
    %c0_9 = arith.constant 0 : index
    %c0_10 = arith.constant 0 : index
    %12 = vector.load %arg4[%c0_9, %c0_10] : memref<128x128xbf16, #tpu.memory_space<vmem>>, vector<128x128xbf16>
    %cst_11 = arith.constant dense<0.000000e+00> : vector<256x128xf32>
    %13 = tpu.matmul %11, %12, %cst_11 {dimension_numbers = #tpu.dot_dimension_numbers<[1], [0], [0], [1], [0, 0, 1, 1], [], []>} : vector<256x128xbf16>, vector<128x128xbf16>, vector<256x128xf32> -> vector<256x128xf32>
    %14 = arith.truncf %13 : vector<256x128xf32> to vector<256x128xbf16>
    %cst_12 = arith.constant dense<0.000000e+00> : vector<256x128xf32>
    %15 = tpu.matmul %0, %14, %cst_12 {dimension_numbers = #tpu.dot_dimension_numbers<[1], [0], [0], [1], [0, 0, 1, 1], [], []>} : vector<256x256xbf16>, vector<256x128xbf16>, vector<256x128xf32> -> vector<256x128xf32>
    %c0_13 = arith.constant 0 : index
    %c0_14 = arith.constant 0 : index
    %16 = vector.load %arg5[%c0_13, %c0_14] : memref<1x128xf32, #tpu.memory_space<vmem>>, vector<1x128xf32>
    %17 = vector.broadcast %16 : vector<1x128xf32> to vector<256x128xf32>
    %18 = arith.addf %15, %17 : vector<256x128xf32>
    %19 = tpu.iota {dimensions = array<i32: 1>} : vector<256x128xi32>
    %c8_i32 = arith.constant 8 : i32
    %20 = vector.broadcast %c8_i32 : i32 to vector<256x128xi32>
    %21 = arith.cmpi slt, %19, %20 : vector<256x128xi32>
    %cst_15 = arith.constant 0xFF800000 : f32
    %22 = vector.broadcast %cst_15 : f32 to vector<256x128xf32>
    %23 = arith.select %21, %18, %22 : vector<256x128xi1>, vector<256x128xf32>
    %cst_16 = arith.constant dense<0xFF800000> : vector<256xf32>
    %24 = vector.multi_reduction <maximumf>, %23, %cst_16 [1] : vector<256x128xf32> to vector<256xf32>
    %25 = vector.shape_cast %24 : vector<256xf32> to vector<256x1xf32>
    %26 = vector.broadcast %25 : vector<256x1xf32> to vector<256x128xf32>
    %27 = arith.subf %23, %26 : vector<256x128xf32>
    %28 = math.exp %27 : vector<256x128xf32>
    %cst_17 = arith.constant dense<0.000000e+00> : vector<256xf32>
    %29 = vector.multi_reduction <add>, %28, %cst_17 [1] : vector<256x128xf32> to vector<256xf32>
    %30 = vector.shape_cast %29 : vector<256xf32> to vector<256x1xf32>
    %31 = math.log %30 : vector<256x1xf32>
    %32 = arith.addf %31, %25 : vector<256x1xf32>
    %33 = vector.broadcast %32 : vector<256x1xf32> to vector<256x128xf32>
    %34 = arith.subf %23, %33 : vector<256x128xf32>
    %c0_18 = arith.constant 0 : index
    %c0_19 = arith.constant 0 : index
    %35 = vector.load %arg6[%c0_18, %c0_19] : memref<256x128xf32, #tpu.memory_space<vmem>>, vector<256x128xf32>
    tpu.vector_store %arg6[%c0_18, %c0_19], %34 {strides = array<i32>} : memref<256x128xf32, #tpu.memory_space<vmem>>, vector<256x128xf32>,
    return
  }
}

</mosaic_0001>

<bundles_post_ra>
// kernel: tpu_custom_call.1
= control target key start
LH: loop header
LB: loop body
LE: loop exit
PB: predicated region body
PF: predicated region fallthrough
CT: control target
= control target key end

     0   :  { %11 = vsyncpa [#allocation3], 0  ;;  %s3208_s0 = inlined_call_operand.hbm [shape: bf16[256,256], index: 0, kind: input, shape index: {}]   ;;  %s3209_s1 = inlined_call_operand.hbm [shape: bf16[256,128], index: 1, kind: input, shape index: {}]   ;;  %s3210_s2 = inlined_call_operand.hbm [shape: bf16[128,128], index: 2, kind: input, shape index: {}]   ;;  %s3211_s3 = inlined_call_operand.vmem [shape: f32[1,128], index: 3, kind: input, shape index: {}]   ;;  %s3212_s4 = inlined_call_operand.hbm [shape: bf16[128,128], index: 4, kind: input, shape index: {}]   ;;  %s3213_s5 = inlined_call_operand.vmem [shape: f32[1,128], index: 5, kind: input, shape index: {}]   ;;  %s3214_s6 = inlined_call_operand.hbm [shape: f32[256,128], index: 6, kind: output, shape index: {}]  }
   0x1   :  { %12 = vsyncpa [#allocation6], 0 }
   0x2   :  { %13 = vsyncpa [#allocation9], 0 }
   0x3   :  { %14 = vsyncpa [#allocation4], 0  ;;  %s2489_s21 = smov [#allocation5]   ;;  %s2371_s25 = scalar_lea.hbm %s3209_s1, 2048 }
   0x4   :  { %s32_s22 = sshll.u32 %s2489_s21, 4  ;;  %p2372_p0 = scmp.ne.s32.totalorder %s3209_s1, %s2371_s25  ;;  %s33_s22 = int_to_ptr.vmem [resolvable:$true] %s32_s22 }
   0x5   :  { %p2375_p1 = scmp.lt.u32.totalorder %s2371_s25, %s3209_s1 }
   0x7   :  { %p2377_p2 = pnand %p2375_p1, %p2372_p0 }
   0x9   :  { %2380 = shalt.err (!%p2377_p2)
}
   0xa   :  { %s2381_s30 = scalar_lea.vmem %s33_s22, 2048  ;;  %p2386_p4 = scmp.lt.s32.totalorder %s33_s22, %s33_s22 }
   0xb   :  { %p2382_p3 = scmp.ne.s32.totalorder %s33_s22, %s2381_s30  ;;  %p2387_p5 = scmp.lt.s32.totalorder %s2381_s30, %s2381_s30 }
   0xd   :  { %p2388_p6 = por %p2387_p5, %p2386_p4 }
   0xf   :  { %p2389_p7 = pnand %p2388_p6, %p2382_p3 }
  0x11   :  { %2392 = shalt.err (!%p2389_p7)
}
  0x12   :  { %s2490_s7 = smov 64   ;;  %s2491_s8 = smov 4  }
  0x13   :  { %38 = dma.hbm_to_vmem [thread:$0]  %s3209_s1, 2048, %s33_s22, [#allocation6], %s2490_s7, %s2490_s7, %s2491_s8  }
  0x14   :  { %s2492_s11 = smov [#allocation2]   ;;  %s2393_s15 = scalar_lea.hbm %s3208_s0, 4096 }
  0x15   :  { %s20_s12 = sshll.u32 %s2492_s11, 4  ;;  %p2394_p8 = scmp.ne.s32.totalorder %s3208_s0, %s2393_s15  ;;  %s21_s12 = int_to_ptr.vmem [resolvable:$true] %s20_s12 }
  0x16   :  { %p2397_p9 = scmp.lt.u32.totalorder %s2393_s15, %s3208_s0 }
  0x18   :  { %p2399_p10 = pnand %p2397_p9, %p2394_p8 }
  0x1a   :  { %2402 = shalt.err (!%p2399_p10)
}
  0x1b   :  { %s2403_s20 = scalar_lea.vmem %s21_s12, 4096  ;;  %p2408_p12 = scmp.lt.s32.totalorder %s21_s12, %s21_s12 }
  0x1c   :  { %p2404_p11 = scmp.ne.s32.totalorder %s21_s12, %s2403_s20  ;;  %p2409_p13 = scmp.lt.s32.totalorder %s2403_s20, %s2403_s20 }
  0x1e   :  { %p2410_p0 = por %p2409_p13, %p2408_p12 }
  0x20   :  { %p2411_p1 = pnand %p2410_p0, %p2404_p11 }
  0x22   :  { %2414 = shalt.err (!%p2411_p1)
}
  0x23   :  { %s2493_s1 = smov 128   ;;  %s2494_s21 = smov 8  }
  0x24   :  { %26 = dma.hbm_to_vmem [thread:$0]  %s3208_s0, 4096, %s21_s12, [#allocation3], %s2493_s1, %s2493_s1, %s2494_s21  }
  0x25   :  { %s2495_s24 = smov [#allocation7]   ;;  %s2496_s26 = smov [#allocation8]  }
  0x26   :  { %s44_s25 = sshll.u32 %s2495_s24, 4  ;;  %s58_s27 = sshll.u32 %s2496_s26, 4  ;;  %s45_s25 = int_to_ptr.vmem [resolvable:$true] %s44_s25  ;;  %s2563_s27 = int_to_ptr.vmem [resolvable:$true] %s58_s27 }
  0x27   :  { %s2415_s30 = scalar_lea.hbm %s3210_s2, 1024 }
  0x28   :  { %p2416_p2 = scmp.ne.s32.totalorder %s3210_s2, %s2415_s30  ;;  %p2419_p3 = scmp.lt.u32.totalorder %s2415_s30, %s3210_s2 }
  0x2a   :  { %p2421_p4 = pnand %p2419_p3, %p2416_p2 }
  0x2c   :  { %2424 = shalt.err (!%p2421_p4)
}
  0x2d   :  { %s2425_s0 = scalar_lea.vmem %s45_s25, 1024  ;;  %p2430_p6 = scmp.lt.s32.totalorder %s45_s25, %s45_s25 }
  0x2e   :  { %p2426_p5 = scmp.ne.s32.totalorder %s45_s25, %s2425_s0  ;;  %p2431_p7 = scmp.lt.s32.totalorder %s2425_s0, %s2425_s0 }
  0x30   :  { %p2432_p8 = por %p2431_p7, %p2430_p6 }
  0x32   :  { %p2433_p9 = pnand %p2432_p8, %p2426_p5 }
  0x34   :  { %2436 = shalt.err (!%p2433_p9)
}
  0x35   :  { %50 = dma.hbm_to_vmem [thread:$0]  %s3210_s2, 1024, %s45_s25, [#allocation6], %s2490_s7, %s2490_s7, %s2491_s8  }
  0x36   :  { %s2437_s17 = scalar_lea.hbm %s3212_s4, 1024 }
  0x37   :  { %p2438_p10 = scmp.ne.s32.totalorder %s3212_s4, %s2437_s17  ;;  %p2441_p11 = scmp.lt.u32.totalorder %s2437_s17, %s3212_s4 }
  0x39   :  { %p2443_p12 = pnand %p2441_p11, %p2438_p10 }
  0x3b   :  { %2446 = shalt.err (!%p2443_p12)
}
  0x3c   :  { %s2447_s23 = scalar_lea.vmem %s2563_s27, 1024  ;;  %p2452_p0 = scmp.lt.s32.totalorder %s2563_s27, %s2563_s27 }
  0x3d   :  { %p2448_p13 = scmp.ne.s32.totalorder %s2563_s27, %s2447_s23  ;;  %p2453_p1 = scmp.lt.s32.totalorder %s2447_s23, %s2447_s23 }
  0x3f   :  { %p2454_p2 = por %p2453_p1, %p2452_p0 }
  0x41   :  { %p2455_p3 = pnand %p2454_p2, %p2448_p13 }
  0x43   :  { %2458 = shalt.err (!%p2455_p3)
}
  0x44   :  { %64 = dma.hbm_to_vmem [thread:$0]  %s3212_s4, 1024, %s2563_s27, [#allocation9], %s2490_s7, %s2490_s7, %s2491_s8  }
  0x45   :  { %2481 = dma.done.wait [#allocation3], 4096  }
  0x46   :  { %2482 = vsyncadd [#allocation3], 4294963200 }
  0x47   :  { %2483 = dma.done.wait [#allocation6], 3072  }
  0x48   :  { %2484 = vsyncadd [#allocation6], 4294964224 }
  0x49   :  { %2485 = dma.done.wait [#allocation9], 1024  }
  0x4a   :  { %2486 = vsyncadd [#allocation9], 4294966272  ;;  %v2163_v0 = vld [vmem:[#allocation5 + $0x40] sm:$0xff]   ;;  %v2165_v2 = vld [vmem:[#allocation5 + $0x48] sm:$0xff]  }
  0x4b   :  { %v2164_v1 = vld [vmem:[#allocation5] sm:$0xff]   ;;  %1770 = vmatprep.subr.bf16.mxu0 %v2163_v0  ;;  %2138 = vmatprep.subr.bf16.mxu1 %v2163_v0  ;;  %v2166_v3 = vld [vmem:[#allocation5 + $0x8] sm:$0xff]   ;;  %v2167_v4 = vld [vmem:[#allocation5 + $0x50] sm:$0xff]  }
  0x4c   :  { %1771 = vmatpush3.bf16.msra.mxu0 %v2164_v1  ;;  %2146 = vmatpush3.bf16.msra.mxu1 %v2164_v1  ;;  %v2168_v5 = vld [vmem:[#allocation5 + $0x10] sm:$0xff]   ;;  %v2169_v6 = vld [vmem:[#allocation5 + $0x58] sm:$0xff]   ;;  %v2171_v8 = vld [vmem:[#allocation5 + $0x60] sm:$0xff]  }
  0x4d   :  { %1772 = vmatprep.subr.bf16.mxu0 %v2165_v2  ;;  %2139 = vmatprep.subr.bf16.mxu1 %v2165_v2  ;;  %v2170_v7 = vld [vmem:[#allocation5 + $0x18] sm:$0xff]   ;;  %v2172_v9 = vld [vmem:[#allocation5 + $0x20] sm:$0xff]   ;;  %v2173_v10 = vld [vmem:[#allocation5 + $0x68] sm:$0xff]  }
  0x4e   :  { %v2600_v11 = vld [vmem:[#allocation2 + $0x4] ss:$8 sps:$4 sm:$0xff]   ;;  %v2175_v13 = vld [vmem:[#allocation5 + $0x70] sm:$0xff]   ;;  %v2177_v16 = vld [vmem:[#allocation5 + $0x78] sm:$0xff]  }
  0x4f   :  { %v2174_v12 = vld [vmem:[#allocation5 + $0x28] sm:$0xff]   ;;  %432 = vmatprep.mubr.bf16.mxu0 %v2600_v11  ;;  %v2176_v14 = vld [vmem:[#allocation5 + $0x30] sm:$0xff]   ;;  %v2178_v17 = vld [vmem:[#allocation5 + $0x38] sm:$0xff]  }
  0x50   :  { %1773 = vmatpush3.bf16.msra.mxu0 %v2166_v3  ;;  %2147 = vmatpush3.bf16.msra.mxu1 %v2166_v3  ;;  %v2603_v15 = vld [vmem:[#allocation2 + $0x84] ss:$8 sps:$4 sm:$0xff]   ;;  %v2606_v18 = vld [vmem:[#allocation2] ss:$8 sps:$4 sm:$0xff]   ;;  %v2608_v19 = vld [vmem:[#allocation2 + $0x14] ss:$8 sps:$4 sm:$0xff]  }
  0x51   :  { %1774 = vmatprep.subr.bf16.mxu0 %v2167_v4  ;;  %2140 = vmatprep.subr.bf16.mxu1 %v2167_v4  ;;  %v2610_v20 = vld [vmem:[#allocation2 + $0x80] ss:$8 sps:$4 sm:$0xff]   ;;  %v2612_v21 = vld [vmem:[#allocation2 + $0x94] ss:$8 sps:$4 sm:$0xff]   ;;  %v2617_v22 = vld [vmem:[#allocation2 + $0x10] ss:$8 sps:$4 sm:$0xff]  }
  0x52   :  { %496 = vmatprep.mubr.bf16.mxu1 %v2603_v15  ;;  %v2620_v23 = vld [vmem:[#allocation2 + $0x24] ss:$8 sps:$4 sm:$0xff]   ;;  %v2622_v24 = vld [vmem:[#allocation2 + $0x90] ss:$8 sps:$4 sm:$0xff]   ;;  %v2629_v29 = vld [vmem:[#allocation2 + $0x20] ss:$8 sps:$4 sm:$0xff]  }
  0x53   :  { %v2227_v25 = vld [vmem:[#allocation7] sm:$0xff]   ;;  %v2228_v26 = vld [vmem:[#allocation7 + $0x8] sm:$0xff]   ;;  %v2229_v28 = vld [vmem:[#allocation7 + $0x10] sm:$0xff]  }
  0x54   :  { %1775 = vmatpush3.bf16.msra.mxu0 %v2168_v5  ;;  %2148 = vmatpush3.bf16.msra.mxu1 %v2168_v5  ;;  %v2624_v27 = vld [vmem:[#allocation2 + $0xa4] ss:$8 sps:$4 sm:$0xff]   ;;  %v2230_v30 = vld [vmem:[#allocation7 + $0x18] sm:$0xff]   ;;  %v2634_v32 = vld [vmem:[#allocation2 + $0xa0] ss:$8 sps:$4 sm:$0xff]  }
  0x55   :  { %1776 = vmatprep.subr.bf16.mxu0 %v2169_v6  ;;  %2141 = vmatprep.subr.bf16.mxu1 %v2169_v6  ;;  %v2632_v31 = vld [vmem:[#allocation2 + $0x34] ss:$8 sps:$4 sm:$0xff]   ;;  %v2642_v34 = vld [vmem:[#allocation2 + $0x30] ss:$8 sps:$4 sm:$0xff]   ;;  %v2644_v35 = vld [vmem:[#allocation2 + $0x44] ss:$8 sps:$4 sm:$0xff]  }
  0x56   :  { %v2636_v33 = vld [vmem:[#allocation2 + $0xb4] ss:$8 sps:$4 sm:$0xff]   ;;  %v2646_v36 = vld [vmem:[#allocation2 + $0xb0] ss:$8 sps:$4 sm:$0xff]   ;;  %v2648_v37 = vld [vmem:[#allocation2 + $0xc4] ss:$8 sps:$4 sm:$0xff]  }
  0x57   :  { %v2654_v38 = vld [vmem:[#allocation2 + $0x40] ss:$8 sps:$4 sm:$0xff]   ;;  %v2656_v39 = vld [vmem:[#allocation2 + $0x54] ss:$8 sps:$4 sm:$0xff]   ;;  %v2666_v42 = vld [vmem:[#allocation2 + $0x50] ss:$8 sps:$4 sm:$0xff]  }
  0x58   :  { %1777 = vmatpush3.bf16.msra.mxu0 %v2170_v7  ;;  %2149 = vmatpush3.bf16.msra.mxu1 %v2170_v7  ;;  %v2658_v40 = vld [vmem:[#allocation2 + $0xc0] ss:$8 sps:$4 sm:$0xff]   ;;  %v2660_v41 = vld [vmem:[#allocation2 + $0xd4] ss:$8 sps:$4 sm:$0xff]   ;;  %v2668_v43 = vld [vmem:[#allocation2 + $0x64] ss:$8 sps:$4 sm:$0xff]  }
  0x59   :  { %1778 = vmatprep.subr.bf16.mxu0 %v2171_v8  ;;  %2142 = vmatprep.subr.bf16.mxu1 %v2171_v8  ;;  %v2670_v44 = vld [vmem:[#allocation2 + $0xd0] ss:$8 sps:$4 sm:$0xff]   ;;  %v2672_v45 = vld [vmem:[#allocation2 + $0xe4] ss:$8 sps:$4 sm:$0xff]   ;;  %v2678_v46 = vld [vmem:[#allocation2 + $0x60] ss:$8 sps:$4 sm:$0xff]  }
  0x5a   :  { %v2680_v47 = vld [vmem:[#allocation2 + $0x74] ss:$8 sps:$4 sm:$0xff]   ;;  %v2682_v48 = vld [vmem:[#allocation2 + $0xe0] ss:$8 sps:$4 sm:$0xff]   ;;  %v2690_v50 = vld [vmem:[#allocation2 + $0x70] ss:$8 sps:$4 sm:$0xff]  }
  0x5b   :  { %v2684_v49 = vld [vmem:[#allocation2 + $0xf4] ss:$8 sps:$4 sm:$0xff]   ;;  %v2692_v51 = vld [vmem:[#allocation2 + $0xf0] ss:$8 sps:$4 sm:$0xff]   ;;  %v2231_v52 = vld [vmem:[#allocation7 + $0x20] sm:$0xff]  }
  0x5c   :  { %1779 = vmatpush3.bf16.msra.mxu0 %v2172_v9  ;;  %2150 = vmatpush3.bf16.msra.mxu1 %v2172_v9  ;;  %3229 = vst [vmem:[#allocation15_spill] sm:$0xff] %v2692_v51  ;;  %v2232_v53 = vld [vmem:[#allocation7 + $0x28] sm:$0xff]   ;;  %v2233_v54 = vld [vmem:[#allocation7 + $0x30] sm:$0xff]   ;;  %v2234_v55 = vld [vmem:[#allocation7 + $0x38] sm:$0xff]  }
  0x5d   :  { %1780 = vmatprep.subr.bf16.mxu0 %v2173_v10  ;;  %2143 = vmatprep.subr.bf16.mxu1 %v2173_v10  ;;  %v2235_v56 = vld [vmem:[#allocation8] sm:$0xff]  }
  0x60   :  { %1781 = vmatpush3.bf16.msra.mxu0 %v2174_v12  ;;  %2151 = vmatpush3.bf16.msra.mxu1 %v2174_v12 }
  0x61   :  { %1782 = vmatprep.subr.bf16.mxu0 %v2175_v13  ;;  %2144 = vmatprep.subr.bf16.mxu1 %v2175_v13 }
  0x64   :  { %1783 = vmatpush3.bf16.msra.mxu0 %v2176_v14  ;;  %2152 = vmatpush3.bf16.msra.mxu1 %v2176_v14 }
  0x65   :  { %1784 = vmatprep.subr.bf16.mxu0 %v2177_v16  ;;  %2145 = vmatprep.subr.bf16.mxu1 %v2177_v16 }
  0x68   :  { %1785 = vmatpush3.bf16.msra.mxu0 %v2178_v17  ;;  %2153 = vmatpush3.bf16.msra.mxu1 %v2178_v17 }
  0x69   :  { %2042 = vmatprep.subr.bf16.mxu1 %v2227_v25 }
  0x6b   :  { %433 = vmatmul.mubr.bf16.vlgmr.msra.gmra.mrb[0].mxu0 %v2606_v18  ;;  %497 = vmatmul.mubr.bf16.vlgmr.msra.gmra.mrb[0].mxu1 %v2610_v20 }
  0x6c   :  { %440 = vmatprep.mubr.bf16.mxu0 %v2608_v19  ;;  %504 = vmatprep.mubr.bf16.mxu1 %v2612_v21 }
  0x6d   :  { %2043 = vmatpush3.bf16.msra.mxu1 %v2227_v25 }
  0x6e   :  { %2044 = vmatprep.subr.bf16.mxu1 %v2228_v26 }
  0x71   :  { %2045 = vmatpush3.bf16.msra.mxu1 %v2228_v26 }
  0x72   :  { %2046 = vmatprep.subr.bf16.mxu1 %v2229_v28 }
  0x73   :  { %441 = vmatmul.mubr.bf16.gmra.mrb[4].mxu0 %v2617_v22  ;;  %505 = vmatmul.mubr.bf16.gmra.mrb[4].mxu1 %v2622_v24 }
  0x74   :  { %448 = vmatprep.mubr.bf16.mxu0 %v2620_v23  ;;  %512 = vmatprep.mubr.bf16.mxu1 %v2624_v27 }
  0x75   :  { %2047 = vmatpush3.bf16.msra.mxu1 %v2229_v28 }
  0x76   :  { %2048 = vmatprep.subr.bf16.mxu1 %v2230_v30 }
  0x79   :  { %2049 = vmatpush3.bf16.msra.mxu1 %v2230_v30  ;;  %v2236_v30 = vld [vmem:[#allocation8 + $0x8] sm:$0xff]  }
  0x7a   :  { %2050 = vmatprep.subr.bf16.mxu1 %v2231_v52 }
  0x7b   :  { %449 = vmatmul.mubr.bf16.gmra.mrb[8].mxu0 %v2629_v29  ;;  %513 = vmatmul.mubr.bf16.gmra.mrb[8].mxu1 %v2634_v32 }
  0x7c   :  { %456 = vmatprep.mubr.bf16.mxu0 %v2632_v31  ;;  %520 = vmatprep.mubr.bf16.mxu1 %v2636_v33 }
  0x7d   :  { %2051 = vmatpush3.bf16.msra.mxu1 %v2231_v52 }
  0x7e   :  { %2052 = vmatprep.subr.bf16.mxu1 %v2232_v53 }
  0x81   :  { %2053 = vmatpush3.bf16.msra.mxu1 %v2232_v53 }
  0x82   :  { %2054 = vmatprep.subr.bf16.mxu1 %v2233_v54 }
  0x83   :  { %457 = vmatmul.mubr.bf16.gmra.mrb[12].mxu0 %v2642_v34  ;;  %521 = vmatmul.mubr.bf16.gmra.mrb[12].mxu1 %v2646_v36 }
  0x84   :  { %464 = vmatprep.mubr.bf16.mxu0 %v2644_v35  ;;  %528 = vmatprep.mubr.bf16.mxu1 %v2648_v37 }
  0x85   :  { %2055 = vmatpush3.bf16.msra.mxu1 %v2233_v54 }
  0x86   :  { %2056 = vmatprep.subr.bf16.mxu1 %v2234_v55 }
  0x89   :  { %2057 = vmatpush3.bf16.msra.mxu1 %v2234_v55 }
  0x8a   :  { %2090 = vmatprep.subr.bf16.mxu1 %v2235_v56 }
  0x8b   :  { %465 = vmatmul.mubr.bf16.gmra.mrb[16].mxu0 %v2654_v38  ;;  %529 = vmatmul.mubr.bf16.gmra.mrb[16].mxu1 %v2658_v40 }
  0x8c   :  { %472 = vmatprep.mubr.bf16.mxu0 %v2656_v39  ;;  %536 = vmatprep.mubr.bf16.mxu1 %v2660_v41 }
  0x93   :  { %473 = vmatmul.mubr.bf16.gmra.mrb[20].mxu0 %v2666_v42  ;;  %537 = vmatmul.mubr.bf16.gmra.mrb[20].mxu1 %v2670_v44 }
  0x94   :  { %480 = vmatprep.mubr.bf16.mxu0 %v2668_v43  ;;  %544 = vmatprep.mubr.bf16.mxu1 %v2672_v45 }
  0x9b   :  { %481 = vmatmul.mubr.bf16.gmra.mrb[24].mxu0 %v2678_v46  ;;  %545 = vmatmul.mubr.bf16.gmra.mrb[24].mxu1 %v2682_v48 }
  0x9c   :  { %488 = vmatprep.mubr.bf16.mxu0 %v2680_v47  ;;  %552 = vmatprep.mubr.bf16.mxu1 %v2684_v49 }
  0xa3   :  { %489 = vmatmul.mubr.bf16.gmra.mrb[28].mxu0 %v2690_v50  ;;  %553 = vmatmul.mubr.bf16.gmra.mrb[28].mxu1 %v2692_v51 }
  0xa4   :  { %1137 = vmatprep.mubr.bf16.mxu0 %v2600_v11 }
 0x13e   :  { %v1786_v57 = vpop.f32.mrb[0].mxu0  ;;  %v1834_v59 = vpop.f32.mrb[0].mxu1 }
 0x13f   :  { %v1787_v58 = vpop.f32.mrb[1].mxu0  ;;  %v1835_v62 = vpop.f32.mrb[1].mxu1 }
 0x140   :  { %v1788_v60 = vadd.f32 %v1787_v58, %v1786_v57  ;;  %v1789_v61 = vpop.f32.mrb[2].mxu0  ;;  %v2697_v0 = vadd.f32 %v1835_v62, %v1834_v59  ;;  %v1837_v1 = vpop.f32.mrb[2].mxu1 }
 0x141   :  { %v1790_v63 = vpop.f32.mrb[3].mxu0  ;;  %v1838_v3 = vpop.f32.mrb[3].mxu1 }
 0x142   :  { %v1791_v2 = vadd.f32 %v1790_v63, %v1789_v61  ;;  %v2699_v4 = vadd.f32 %v1838_v3, %v1837_v1 }
 0x144   :  { %v561_v5 = vpack.c.bf16 %v1791_v2, %v1788_v60  ;;  %v2237_v60 = vld [vmem:[#allocation8 + $0x10] sm:$0xff]  }
 0x146   :  { %v1792_v7 = vpop.f32.mrb[4].mxu0  ;;  %2058 = vmatprep.mubr.bf16.mxu1 %v561_v5  ;;  %v1840_v9 = vpop.f32.mrb[4].mxu1 }
 0x147   :  { %v1793_v8 = vpop.f32.mrb[5].mxu0  ;;  %v1841_v12 = vpop.f32.mrb[5].mxu1 }
 0x148   :  { %v1794_v10 = vadd.f32 %v1793_v8, %v1792_v7  ;;  %v1795_v11 = vpop.f32.mrb[6].mxu0  ;;  %v2703_v14 = vadd.f32 %v1841_v12, %v1840_v9  ;;  %v1843_v16 = vpop.f32.mrb[6].mxu1  ;;  %v2238_v7 = vld [vmem:[#allocation8 + $0x18] sm:$0xff]  }
 0x149   :  { %v1796_v13 = vpop.f32.mrb[7].mxu0  ;;  %v1844_v25 = vpop.f32.mrb[7].mxu1 }
 0x14a   :  { %v1797_v17 = vadd.f32 %v1796_v13, %v1795_v11  ;;  %v2705_v26 = vadd.f32 %v1844_v25, %v1843_v16  ;;  %v2239_v16 = vld [vmem:[#allocation8 + $0x20] sm:$0xff]  }
 0x14c   :  { %v562_v28 = vpack.c.bf16 %v1797_v17, %v1794_v10 }
 0x14e   :  { %v1798_v53 = vpop.f32.mrb[8].mxu0  ;;  %2059 = vmatmul.mubr.bf16.vlgmr.msra.gmra.mrb[32].mxu1 %v562_v28  ;;  %v1846_v55 = vpop.f32.mrb[8].mxu1 }
 0x14f   :  { %v1799_v54 = vpop.f32.mrb[9].mxu0  ;;  %2091 = vmatpush3.bf16.msra.mxu1 %v2235_v56  ;;  %v1847_v59 = vpop.f32.mrb[9].mxu1 }
 0x150   :  { %v1800_v57 = vadd.f32 %v1799_v54, %v1798_v53  ;;  %v1801_v58 = vpop.f32.mrb[10].mxu0  ;;  %2092 = vmatprep.subr.bf16.mxu1 %v2236_v30  ;;  %v2709_v62 = vadd.f32 %v1847_v59, %v1846_v55  ;;  %v1849_v63 = vpop.f32.mrb[10].mxu1 }
 0x151   :  { %v1802_v61 = vpop.f32.mrb[11].mxu0  ;;  %v1850_v2 = vpop.f32.mrb[11].mxu1 }
 0x152   :  { %v1803_v1 = vadd.f32 %v1802_v61, %v1801_v58  ;;  %v2711_v3 = vadd.f32 %v1850_v2, %v1849_v63 }
 0x153   :  { %2093 = vmatpush3.bf16.msra.mxu1 %v2236_v30 }
 0x154   :  { %v563_v5 = vpack.c.bf16 %v1803_v1, %v1800_v57  ;;  %2094 = vmatprep.subr.bf16.mxu1 %v2237_v60  ;;  %v2240_v57 = vld [vmem:[#allocation8 + $0x28] sm:$0xff]  }
 0x156   :  { %v1804_v8 = vpop.f32.mrb[12].mxu0  ;;  %2062 = vmatprep.mubr.bf16.mxu1 %v563_v5  ;;  %v1852_v10 = vpop.f32.mrb[12].mxu1 }
 0x157   :  { %v1805_v9 = vpop.f32.mrb[13].mxu0  ;;  %2095 = vmatpush3.bf16.msra.mxu1 %v2237_v60  ;;  %v1853_v13 = vpop.f32.mrb[13].mxu1 }
 0x158   :  { %v1806_v11 = vadd.f32 %v1805_v9, %v1804_v8  ;;  %v1807_v12 = vpop.f32.mrb[14].mxu0  ;;  %2096 = vmatprep.subr.bf16.mxu1 %v2238_v7  ;;  %v2715_v25 = vadd.f32 %v1853_v13, %v1852_v10  ;;  %v1855_v28 = vpop.f32.mrb[14].mxu1 }
 0x159   :  { %v1808_v17 = vpop.f32.mrb[15].mxu0  ;;  %v1856_v53 = vpop.f32.mrb[15].mxu1 }
 0x15a   :  { %v1809_v30 = vadd.f32 %v1808_v17, %v1807_v12  ;;  %v2717_v54 = vadd.f32 %v1856_v53, %v1855_v28 }
 0x15b   :  { %2097 = vmatpush3.bf16.msra.mxu1 %v2238_v7 }
 0x15c   :  { %v564_v55 = vpack.c.bf16 %v1809_v30, %v1806_v11  ;;  %2098 = vmatprep.subr.bf16.mxu1 %v2239_v16 }
 0x15e   :  { %v1810_v59 = vpop.f32.mrb[16].mxu0  ;;  %2063 = vmatmul.mubr.bf16.gmra.mrb[36].mxu1 %v564_v55  ;;  %v1858_v61 = vpop.f32.mrb[16].mxu1 }
 0x15f   :  { %v1811_v60 = vpop.f32.mrb[17].mxu0  ;;  %2099 = vmatpush3.bf16.msra.mxu1 %v2239_v16  ;;  %v1859_v2 = vpop.f32.mrb[17].mxu1 }
 0x160   :  { %v1812_v63 = vadd.f32 %v1811_v60, %v1810_v59  ;;  %v1813_v1 = vpop.f32.mrb[18].mxu0  ;;  %2100 = vmatprep.subr.bf16.mxu1 %v2240_v57  ;;  %v1860_v8 = vadd.f32 %v1859_v2, %v1858_v61  ;;  %v1861_v9 = vpop.f32.mrb[18].mxu1 }
 0x161   :  { %v1814_v5 = vpop.f32.mrb[19].mxu0  ;;  %v1862_v7 = vpop.f32.mrb[19].mxu1 }
 0x162   :  { %v1815_v10 = vadd.f32 %v1814_v5, %v1813_v1  ;;  %v1863_v11 = vadd.f32 %v1862_v7, %v1861_v9 }
 0x163   :  { %2101 = vmatpush3.bf16.msra.mxu1 %v2240_v57 }
 0x164   :  { %v565_v12 = vpack.c.bf16 %v1815_v10, %v1812_v63  ;;  %v573_v13 = vpack.c.bf16 %v1863_v11, %v1860_v8 }
 0x166   :  { %v1816_v17 = vpop.f32.mrb[20].mxu0  ;;  %2066 = vmatprep.mubr.bf16.mxu1 %v565_v12  ;;  %v1864_v30 = vpop.f32.mrb[20].mxu1 }
 0x167   :  { %v1817_v28 = vpop.f32.mrb[21].mxu0  ;;  %v1865_v16 = vpop.f32.mrb[21].mxu1 }
 0x168   :  { %v1818_v53 = vadd.f32 %v1817_v28, %v1816_v17  ;;  %v1819_v55 = vpop.f32.mrb[22].mxu0  ;;  %v1866_v60 = vadd.f32 %v1865_v16, %v1864_v30  ;;  %v1867_v58 = vpop.f32.mrb[22].mxu1 }
 0x169   :  { %v1820_v59 = vpop.f32.mrb[23].mxu0  ;;  %v1868_v52 = vpop.f32.mrb[23].mxu1 }
 0x16a   :  { %v1821_v56 = vadd.f32 %v1820_v59, %v1819_v55  ;;  %v1869_v61 = vadd.f32 %v1868_v52, %v1867_v58 }
 0x16c   :  { %v566_v2 = vpack.c.bf16 %v1821_v56, %v1818_v53  ;;  %v574_v1 = vpack.c.bf16 %v1869_v61, %v1866_v60 }
 0x16e   :  { %v1822_v5 = vpop.f32.mrb[24].mxu0  ;;  %2067 = vmatmul.mubr.bf16.gmra.mrb[40].mxu1 %v566_v2  ;;  %v1870_v63 = vpop.f32.mrb[24].mxu1 }
 0x16f   :  { %v1823_v57 = vpop.f32.mrb[25].mxu0  ;;  %v1871_v10 = vpop.f32.mrb[25].mxu1 }
 0x170   :  { %v1824_v8 = vadd.f32 %v1823_v57, %v1822_v5  ;;  %v1825_v9 = vpop.f32.mrb[26].mxu0  ;;  %v1872_v11 = vadd.f32 %v1871_v10, %v1870_v63  ;;  %v1873_v12 = vpop.f32.mrb[26].mxu1 }
 0x171   :  { %v1826_v7 = vpop.f32.mrb[27].mxu0  ;;  %v1874_v28 = vpop.f32.mrb[27].mxu1 }
 0x172   :  { %v1827_v17 = vadd.f32 %v1826_v7, %v1825_v9  ;;  %v1875_v6 = vadd.f32 %v1874_v28, %v1873_v12  ;;  %v3232_v9 = vpack.c.bf16 %v2711_v3, %v2709_v62  ;;  %v3233_v7 = vpack.c.bf16 %v2717_v54, %v2715_v25 }
 0x174   :  { %v567_v30 = vpack.c.bf16 %v1827_v17, %v1824_v8  ;;  %v575_v16 = vpack.c.bf16 %v1875_v6, %v1872_v11  ;;  %v3230_v8 = vpack.c.bf16 %v2699_v4, %v2697_v0  ;;  %v3231_v6 = vpack.c.bf16 %v2705_v26, %v2703_v14  ;;  %v2242_v0 = vld [vmem:[#allocation8 + $0x38] sm:$0xff]   ;;  %v2736_v4 = vld [vmem:[%s3211_s3] ss:$0 sm:$0xff] }
 0x176   :  { %v1828_v55 = vpop.f32.mrb[28].mxu0  ;;  %2070 = vmatprep.mubr.bf16.mxu1 %v567_v30  ;;  %v1876_v56 = vpop.f32.mrb[28].mxu1 }
 0x177   :  { %v1829_v52 = vpop.f32.mrb[29].mxu0  ;;  %v1877_v59 = vpop.f32.mrb[29].mxu1 }
 0x178   :  { %v1830_v58 = vadd.f32 %v1829_v52, %v1828_v55  ;;  %v1831_v53 = vpop.f32.mrb[30].mxu0  ;;  %v1878_v61 = vadd.f32 %v1877_v59, %v1876_v56  ;;  %v1879_v2 = vpop.f32.mrb[30].mxu1 }
 0x179   :  { %v1832_v60 = vpop.f32.mrb[31].mxu0  ;;  %v1880_v57 = vpop.f32.mrb[31].mxu1 }
 0x17a   :  { %v1833_v5 = vadd.f32 %v1832_v60, %v1831_v53  ;;  %v1881_v51 = vadd.f32 %v1880_v57, %v1879_v2 }
 0x17c   :  { %v568_v63 = vpack.c.bf16 %v1833_v5, %v1830_v58  ;;  %v576_v10 = vpack.c.bf16 %v1881_v51, %v1878_v61  ;;  %v2241_v51 = vld [vmem:[#allocation8 + $0x30] sm:$0xff]  }
 0x17d   :  { %2102 = vmatprep.subr.bf16.mxu1 %v2241_v51 }
 0x17e   :  { %2071 = vmatmul.mubr.bf16.gmra.mrb[44].mxu1 %v568_v63 }
 0x17f   :  { %2074 = vmatprep.mubr.bf16.mxu1 %v3230_v8  ;;  %2103 = vmatpush3.bf16.msra.mxu1 %v2241_v51 }
 0x180   :  { %2104 = vmatprep.subr.bf16.mxu1 %v2242_v0 }
 0x183   :  { %2105 = vmatpush3.bf16.msra.mxu1 %v2242_v0 }
 0x186   :  { %2075 = vmatmul.mubr.bf16.gmra.mrb[48].mxu1 %v3231_v6 }
 0x187   :  { %2078 = vmatprep.mubr.bf16.mxu1 %v3232_v9 }
 0x18e   :  { %2079 = vmatmul.mubr.bf16.gmra.mrb[52].mxu1 %v3233_v7 }
 0x18f   :  { %2082 = vmatprep.mubr.bf16.mxu1 %v573_v13 }
 0x196   :  { %2083 = vmatmul.mubr.bf16.gmra.mrb[56].mxu1 %v574_v1 }
 0x197   :  { %2086 = vmatprep.mubr.bf16.mxu1 %v575_v16 }
 0x19e   :  { %2087 = vmatmul.mubr.bf16.gmra.mrb[60].mxu1 %v576_v10 }
 0x221   :  { %v2060_v14 = vpop.f32.mrb[32].mxu1 }
 0x222   :  { %v691_v26 = vadd.f32 %v2060_v14, %v2736_v4  ;;  %v682_v62 = vpop.f32.mrb[33].mxu1 }
 0x223   :  { %v683_v3 = vadd.f32 %v2736_v4, %v682_v62  ;;  %v2061_v25 = vpop.f32.mrb[34].mxu1 }
 0x224   :  { %v694_v54 = vadd.f32 %v2061_v25, %v2736_v4  ;;  %v685_v13 = vpop.f32.mrb[35].mxu1  ;;  %v811_v11 = vmax.f32 %v691_v26, 0.0 }
 0x225   :  { %v686_v1 = vadd.f32 %v2736_v4, %v685_v13  ;;  %v809_v17 = vmax.f32 %v683_v3, 0.0 }
 0x226   :  { %v812_v12 = vmax.f32 %v694_v54, 0.0 }
 0x227   :  { %v810_v28 = vmax.f32 %v686_v1, 0.0 }
 0x228   :  { %v842_v30 = vpack.c.bf16 %v812_v12, %v811_v11 }
 0x229   :  { %v841_v16 = vpack.c.bf16 %v810_v28, %v809_v17 }
 0x22b   :  { %2106 = vmatprep.mubr.bf16.mxu1 %v841_v16 }
 0x22c   :  { %2107 = vmatmul.mubr.bf16.vlgmr.msra.gmra.mrb[64].mxu1 %v842_v30 }
 0x231   :  { %v2064_v55 = vpop.f32.mrb[36].mxu1 }
 0x232   :  { %v707_v52 = vadd.f32 %v2064_v55, %v2736_v4  ;;  %v698_v56 = vpop.f32.mrb[37].mxu1 }
 0x233   :  { %v699_v58 = vadd.f32 %v2736_v4, %v698_v56  ;;  %v2065_v53 = vpop.f32.mrb[38].mxu1 }
 0x234   :  { %v710_v59 = vadd.f32 %v2065_v53, %v2736_v4  ;;  %v701_v60 = vpop.f32.mrb[39].mxu1  ;;  %v815_v2 = vmax.f32 %v707_v52, 0.0 }
 0x235   :  { %v702_v61 = vadd.f32 %v2736_v4, %v701_v60  ;;  %v813_v57 = vmax.f32 %v699_v58, 0.0 }
 0x236   :  { %v816_v5 = vmax.f32 %v710_v59, 0.0 }
 0x237   :  { %v814_v63 = vmax.f32 %v702_v61, 0.0 }
 0x238   :  { %v844_v10 = vpack.c.bf16 %v816_v5, %v815_v2 }
 0x239   :  { %v843_v8 = vpack.c.bf16 %v814_v63, %v813_v57 }
 0x23b   :  { %2110 = vmatprep.mubr.bf16.mxu1 %v843_v8 }
 0x23c   :  { %2111 = vmatmul.mubr.bf16.gmra.mrb[68].mxu1 %v844_v10 }
 0x241   :  { %v2068_v6 = vpop.f32.mrb[40].mxu1 }
 0x242   :  { %v723_v9 = vadd.f32 %v2068_v6, %v2736_v4  ;;  %v714_v7 = vpop.f32.mrb[41].mxu1 }
 0x243   :  { %v715_v51 = vadd.f32 %v2736_v4, %v714_v7  ;;  %v2069_v0 = vpop.f32.mrb[42].mxu1 }
 0x244   :  { %v726_v14 = vadd.f32 %v2069_v0, %v2736_v4  ;;  %v717_v26 = vpop.f32.mrb[43].mxu1  ;;  %v819_v3 = vmax.f32 %v723_v9, 0.0 }
 0x245   :  { %v718_v62 = vadd.f32 %v2736_v4, %v717_v26  ;;  %v817_v54 = vmax.f32 %v715_v51, 0.0 }
 0x246   :  { %v820_v25 = vmax.f32 %v726_v14, 0.0 }
 0x247   :  { %v818_v13 = vmax.f32 %v718_v62, 0.0 }
 0x248   :  { %v846_v1 = vpack.c.bf16 %v820_v25, %v819_v3 }
 0x249   :  { %v845_v11 = vpack.c.bf16 %v818_v13, %v817_v54 }
 0x24b   :  { %2114 = vmatprep.mubr.bf16.mxu1 %v845_v11 }
 0x24c   :  { %2115 = vmatmul.mubr.bf16.gmra.mrb[72].mxu1 %v846_v1 }
 0x251   :  { %v2072_v12 = vpop.f32.mrb[44].mxu1 }
 0x252   :  { %v739_v17 = vadd.f32 %v2072_v12, %v2736_v4  ;;  %v730_v28 = vpop.f32.mrb[45].mxu1 }
 0x253   :  { %v731_v30 = vadd.f32 %v2736_v4, %v730_v28  ;;  %v2073_v16 = vpop.f32.mrb[46].mxu1 }
 0x254   :  { %v742_v55 = vadd.f32 %v2073_v16, %v2736_v4  ;;  %v733_v52 = vpop.f32.mrb[47].mxu1  ;;  %v823_v58 = vmax.f32 %v739_v17, 0.0 }
 0x255   :  { %v734_v56 = vadd.f32 %v2736_v4, %v733_v52  ;;  %v821_v59 = vmax.f32 %v731_v30, 0.0 }
 0x256   :  { %v824_v53 = vmax.f32 %v742_v55, 0.0 }
 0x257   :  { %v822_v60 = vmax.f32 %v734_v56, 0.0 }
 0x258   :  { %v848_v61 = vpack.c.bf16 %v824_v53, %v823_v58 }
 0x259   :  { %v847_v2 = vpack.c.bf16 %v822_v60, %v821_v59  ;;  %v2076_v5 = vpop.f32.mrb[48].mxu1 }
 0x25a   :  { %v755_v57 = vadd.f32 %v2076_v5, %v2736_v4  ;;  %v746_v63 = vpop.f32.mrb[49].mxu1 }
 0x25b   :  { %v747_v10 = vadd.f32 %v2736_v4, %v746_v63  ;;  %v2077_v8 = vpop.f32.mrb[50].mxu1  ;;  %2118 = vmatprep.mubr.bf16.mxu1 %v847_v2 }
 0x25c   :  { %v758_v6 = vadd.f32 %v2077_v8, %v2736_v4  ;;  %v749_v9 = vpop.f32.mrb[51].mxu1  ;;  %2119 = vmatmul.mubr.bf16.gmra.mrb[76].mxu1 %v848_v61  ;;  %v827_v51 = vmax.f32 %v755_v57, 0.0 }
 0x25d   :  { %v750_v7 = vadd.f32 %v2736_v4, %v749_v9  ;;  %v825_v14 = vmax.f32 %v747_v10, 0.0 }
 0x25e   :  { %v828_v0 = vmax.f32 %v758_v6, 0.0 }
 0x25f   :  { %v826_v26 = vmax.f32 %v750_v7, 0.0 }
 0x260   :  { %v850_v62 = vpack.c.bf16 %v828_v0, %v827_v51 }
 0x261   :  { %v849_v3 = vpack.c.bf16 %v826_v26, %v825_v14  ;;  %v2080_v25 = vpop.f32.mrb[52].mxu1 }
 0x262   :  { %v771_v54 = vadd.f32 %v2080_v25, %v2736_v4  ;;  %v762_v13 = vpop.f32.mrb[53].mxu1 }
 0x263   :  { %v763_v1 = vadd.f32 %v2736_v4, %v762_v13  ;;  %v2081_v11 = vpop.f32.mrb[54].mxu1  ;;  %2122 = vmatprep.mubr.bf16.mxu1 %v849_v3 }
 0x264   :  { %v774_v12 = vadd.f32 %v2081_v11, %v2736_v4  ;;  %v765_v17 = vpop.f32.mrb[55].mxu1  ;;  %2123 = vmatmul.mubr.bf16.gmra.mrb[80].mxu1 %v850_v62  ;;  %v831_v30 = vmax.f32 %v771_v54, 0.0 }
 0x265   :  { %v766_v28 = vadd.f32 %v2736_v4, %v765_v17  ;;  %v829_v55 = vmax.f32 %v763_v1, 0.0 }
 0x266   :  { %v832_v16 = vmax.f32 %v774_v12, 0.0 }
 0x267   :  { %v830_v52 = vmax.f32 %v766_v28, 0.0 }
 0x268   :  { %v852_v56 = vpack.c.bf16 %v832_v16, %v831_v30 }
 0x269   :  { %v851_v58 = vpack.c.bf16 %v830_v52, %v829_v55  ;;  %v2084_v53 = vpop.f32.mrb[56].mxu1 }
 0x26a   :  { %v787_v59 = vadd.f32 %v2084_v53, %v2736_v4  ;;  %v778_v60 = vpop.f32.mrb[57].mxu1 }
 0x26b   :  { %v779_v61 = vadd.f32 %v2736_v4, %v778_v60  ;;  %v2085_v2 = vpop.f32.mrb[58].mxu1  ;;  %2126 = vmatprep.mubr.bf16.mxu1 %v851_v58 }
 0x26c   :  { %v790_v5 = vadd.f32 %v2085_v2, %v2736_v4  ;;  %v781_v57 = vpop.f32.mrb[59].mxu1  ;;  %2127 = vmatmul.mubr.bf16.gmra.mrb[84].mxu1 %v852_v56  ;;  %v835_v10 = vmax.f32 %v787_v59, 0.0 }
 0x26d   :  { %v782_v63 = vadd.f32 %v2736_v4, %v781_v57  ;;  %v833_v6 = vmax.f32 %v779_v61, 0.0 }
 0x26e   :  { %v836_v8 = vmax.f32 %v790_v5, 0.0 }
 0x26f   :  { %v834_v9 = vmax.f32 %v782_v63, 0.0 }
 0x270   :  { %v854_v7 = vpack.c.bf16 %v836_v8, %v835_v10 }
 0x271   :  { %v853_v51 = vpack.c.bf16 %v834_v9, %v833_v6  ;;  %v2088_v0 = vpop.f32.mrb[60].mxu1 }
 0x272   :  { %v803_v14 = vadd.f32 %v2088_v0, %v2736_v4  ;;  %v794_v26 = vpop.f32.mrb[61].mxu1 }
 0x273   :  { %v795_v62 = vadd.f32 %v2736_v4, %v794_v26  ;;  %v2089_v3 = vpop.f32.mrb[62].mxu1  ;;  %2130 = vmatprep.mubr.bf16.mxu1 %v853_v51 }
 0x274   :  { %v806_v25 = vadd.f32 %v2089_v3, %v2736_v4  ;;  %v797_v54 = vpop.f32.mrb[63].mxu1  ;;  %2131 = vmatmul.mubr.bf16.gmra.mrb[88].mxu1 %v854_v7  ;;  %v839_v1 = vmax.f32 %v803_v14, 0.0 }
 0x275   :  { %v798_v13 = vadd.f32 %v2736_v4, %v797_v54  ;;  %v837_v12 = vmax.f32 %v795_v62, 0.0 }
 0x276   :  { %v840_v11 = vmax.f32 %v806_v25, 0.0 }
 0x277   :  { %v838_v17 = vmax.f32 %v798_v13, 0.0 }
 0x278   :  { %v856_v28 = vpack.c.bf16 %v840_v11, %v839_v1 }
 0x279   :  { %v855_v30 = vpack.c.bf16 %v838_v17, %v837_v12 }
 0x27b   :  { %2134 = vmatprep.mubr.bf16.mxu1 %v855_v30 }
 0x27c   :  { %2135 = vmatmul.mubr.bf16.gmra.mrb[92].mxu1 %v856_v28 }
 0x2ff   :  { %v2108_v16 = vpop.f32.mrb[64].mxu1 }
 0x300   :  { %v955_v55 = vpop.f32.mrb[65].mxu1 }
 0x301   :  { %v2109_v52 = vpop.f32.mrb[66].mxu1 }
 0x302   :  { %v1083_v56 = vpack.c.bf16 %v2109_v52, %v2108_v16  ;;  %v958_v58 = vpop.f32.mrb[67].mxu1 }
 0x303   :  { %v1082_v53 = vpack.c.bf16 %v958_v58, %v955_v55 }
 0x30f   :  { %v2112_v59 = vpop.f32.mrb[68].mxu1 }
 0x310   :  { %v971_v60 = vpop.f32.mrb[69].mxu1 }
 0x311   :  { %v2113_v61 = vpop.f32.mrb[70].mxu1 }
 0x312   :  { %v1085_v2 = vpack.c.bf16 %v2113_v61, %v2112_v59  ;;  %v974_v5 = vpop.f32.mrb[71].mxu1 }
 0x313   :  { %v1084_v4 = vpack.c.bf16 %v974_v5, %v971_v60 }
 0x31f   :  { %v2116_v57 = vpop.f32.mrb[72].mxu1 }
 0x320   :  { %v987_v63 = vpop.f32.mrb[73].mxu1 }
 0x321   :  { %v2117_v10 = vpop.f32.mrb[74].mxu1 }
 0x322   :  { %v1087_v8 = vpack.c.bf16 %v2117_v10, %v2116_v57  ;;  %v990_v6 = vpop.f32.mrb[75].mxu1 }
 0x323   :  { %v1086_v9 = vpack.c.bf16 %v990_v6, %v987_v63 }
 0x32f   :  { %v2120_v7 = vpop.f32.mrb[76].mxu1 }
 0x330   :  { %v1003_v51 = vpop.f32.mrb[77].mxu1 }
 0x331   :  { %v2121_v0 = vpop.f32.mrb[78].mxu1 }
 0x332   :  { %v1089_v14 = vpack.c.bf16 %v2121_v0, %v2120_v7  ;;  %v1006_v26 = vpop.f32.mrb[79].mxu1 }
 0x333   :  { %v1088_v62 = vpack.c.bf16 %v1006_v26, %v1003_v51 }
 0x337   :  { %v2124_v3 = vpop.f32.mrb[80].mxu1 }
 0x338   :  { %v1019_v25 = vpop.f32.mrb[81].mxu1 }
 0x339   :  { %v2125_v54 = vpop.f32.mrb[82].mxu1 }
 0x33a   :  { %v1091_v13 = vpack.c.bf16 %v2125_v54, %v2124_v3  ;;  %v1022_v1 = vpop.f32.mrb[83].mxu1 }
 0x33b   :  { %v1090_v11 = vpack.c.bf16 %v1022_v1, %v1019_v25 }
 0x33d   :  { %1930 = vmatprep.subr.bf16.mxu0 %v1090_v11 }
 0x33e   :  { %1931 = vmatpush3.bf16.msra.mxu0 %v1082_v53 }
 0x33f   :  { %v2128_v12 = vpop.f32.mrb[84].mxu1  ;;  %1932 = vmatprep.subr.bf16.mxu0 %v1091_v13 }
 0x340   :  { %v1035_v17 = vpop.f32.mrb[85].mxu1 }
 0x341   :  { %v2129_v28 = vpop.f32.mrb[86].mxu1 }
 0x342   :  { %v1093_v30 = vpack.c.bf16 %v2129_v28, %v2128_v12  ;;  %v1038_v16 = vpop.f32.mrb[87].mxu1  ;;  %1933 = vmatpush3.bf16.msra.mxu0 %v1083_v56 }
 0x343   :  { %v1092_v55 = vpack.c.bf16 %v1038_v16, %v1035_v17 }
 0x345   :  { %1934 = vmatprep.subr.bf16.mxu0 %v1092_v55 }
 0x346   :  { %1935 = vmatpush3.bf16.msra.mxu0 %v1084_v4 }
 0x347   :  { %v2132_v52 = vpop.f32.mrb[88].mxu1  ;;  %1936 = vmatprep.subr.bf16.mxu0 %v1093_v30 }
 0x348   :  { %v1051_v58 = vpop.f32.mrb[89].mxu1 }
 0x349   :  { %v2133_v59 = vpop.f32.mrb[90].mxu1 }
 0x34a   :  { %v1095_v60 = vpack.c.bf16 %v2133_v59, %v2132_v52  ;;  %v1054_v61 = vpop.f32.mrb[91].mxu1  ;;  %1937 = vmatpush3.bf16.msra.mxu0 %v1085_v2 }
 0x34b   :  { %v1094_v5 = vpack.c.bf16 %v1054_v61, %v1051_v58 }
 0x34d   :  { %1938 = vmatprep.subr.bf16.mxu0 %v1094_v5 }
 0x34e   :  { %1939 = vmatpush3.bf16.msra.mxu0 %v1086_v9 }
 0x34f   :  { %v2136_v53 = vpop.f32.mrb[92].mxu1  ;;  %1940 = vmatprep.subr.bf16.mxu0 %v1095_v60 }
 0x350   :  { %v1067_v57 = vpop.f32.mrb[93].mxu1 }
 0x351   :  { %v2137_v63 = vpop.f32.mrb[94].mxu1 }
 0x352   :  { %v1097_v10 = vpack.c.bf16 %v2137_v63, %v2136_v53  ;;  %v1070_v6 = vpop.f32.mrb[95].mxu1  ;;  %1941 = vmatpush3.bf16.msra.mxu0 %v1087_v8 }
 0x353   :  { %v1096_v56 = vpack.c.bf16 %v1070_v6, %v1067_v57 }
 0x355   :  { %1942 = vmatprep.subr.bf16.mxu0 %v1096_v56 }
 0x356   :  { %1943 = vmatpush3.bf16.msra.mxu0 %v1088_v62 }
 0x357   :  { %1944 = vmatprep.subr.bf16.mxu0 %v1097_v10 }
 0x35a   :  { %1945 = vmatpush3.bf16.msra.mxu0 %v1089_v14 }
 0x35d   :  { %1138 = vmatmul.mubr.bf16.vlgmr.msra.gmra.mrb[32].mxu0 %v2606_v18  ;;  %v1266_v18 = vlaneseq }
 0x35e   :  { %1145 = vmatprep.mubr.bf16.mxu0 %v2608_v19 }
 0x35f   :  { %v2801_v19 = vand.u32 127, %v1266_v18 }
 0x361   :  { %vm1268_vm0 = vcmp.lt.s32.totalorder %v2801_v19, 8 }
 0x365   :  { %1146 = vmatmul.mubr.bf16.gmra.mrb[36].mxu0 %v2617_v22 }
 0x366   :  { %1153 = vmatprep.mubr.bf16.mxu0 %v2620_v23 }
 0x36d   :  { %1154 = vmatmul.mubr.bf16.gmra.mrb[40].mxu0 %v2629_v29 }
 0x36e   :  { %1161 = vmatprep.mubr.bf16.mxu0 %v2632_v31 }
 0x375   :  { %1162 = vmatmul.mubr.bf16.gmra.mrb[44].mxu0 %v2642_v34 }
 0x376   :  { %1169 = vmatprep.mubr.bf16.mxu0 %v2644_v35 }
 0x37d   :  { %1170 = vmatmul.mubr.bf16.gmra.mrb[48].mxu0 %v2654_v38 }
 0x37e   :  { %1177 = vmatprep.mubr.bf16.mxu0 %v2656_v39 }
 0x385   :  { %1178 = vmatmul.mubr.bf16.gmra.mrb[52].mxu0 %v2666_v42 }
 0x386   :  { %1185 = vmatprep.mubr.bf16.mxu0 %v2668_v43 }
 0x38d   :  { %1186 = vmatmul.mubr.bf16.gmra.mrb[56].mxu0 %v2678_v46 }
 0x38e   :  { %1193 = vmatprep.mubr.bf16.mxu0 %v2680_v47 }
 0x395   :  { %1194 = vmatmul.mubr.bf16.gmra.mrb[60].mxu0 %v2690_v50 }
 0x396   :  { %1201 = vmatprep.mubr.bf16.mxu0 %v2603_v15  ;;  %v3234_v15 = vld [vmem:[#allocation15_spill] sm:$0xff] }
 0x39d   :  { %1202 = vmatmul.mubr.bf16.gmra.mrb[64].mxu0 %v2610_v20 }
 0x39e   :  { %1209 = vmatprep.mubr.bf16.mxu0 %v2612_v21  ;;  %v2806_v21 = vld [vmem:[%s3213_s5] ss:$0 sm:$0xff]  ;;  %s2497_s5 = smov [#allocation10]  }
 0x39f   :  { %s1690_s25 = sshll.u32 %s2497_s5, 4  ;;  %s1691_s25 = int_to_ptr.vmem [resolvable:$true] %s1690_s25 }
 0x3a0   :  { %s2459_s26 = scalar_lea.vmem %s1691_s25, 4096  ;;  %p2464_p5 = scmp.lt.s32.totalorder %s1691_s25, %s1691_s25 }
 0x3a1   :  { %p2460_p4 = scmp.ne.s32.totalorder %s1691_s25, %s2459_s26  ;;  %p2465_p6 = scmp.lt.s32.totalorder %s2459_s26, %s2459_s26 }
 0x3a3   :  { %p2466_p7 = por %p2465_p6, %p2464_p5 }
 0x3a5   :  { %1210 = vmatmul.mubr.bf16.gmra.mrb[68].mxu0 %v2622_v24  ;;  %p2467_p8 = pnand %p2466_p7, %p2460_p4 }
 0x3a6   :  { %1217 = vmatprep.mubr.bf16.mxu0 %v2624_v27 }
 0x3ad   :  { %1218 = vmatmul.mubr.bf16.gmra.mrb[72].mxu0 %v2634_v32 }
 0x3ae   :  { %1225 = vmatprep.mubr.bf16.mxu0 %v2636_v33 }
 0x3b5   :  { %1226 = vmatmul.mubr.bf16.gmra.mrb[76].mxu0 %v2646_v36 }
 0x3b6   :  { %1233 = vmatprep.mubr.bf16.mxu0 %v2648_v37 }
 0x3bd   :  { %1234 = vmatmul.mubr.bf16.gmra.mrb[80].mxu0 %v2658_v40 }
 0x3be   :  { %1241 = vmatprep.mubr.bf16.mxu0 %v2660_v41 }
 0x3c5   :  { %1242 = vmatmul.mubr.bf16.gmra.mrb[84].mxu0 %v2670_v44 }
 0x3c6   :  { %1249 = vmatprep.mubr.bf16.mxu0 %v2672_v45 }
 0x3cd   :  { %1250 = vmatmul.mubr.bf16.gmra.mrb[88].mxu0 %v2682_v48 }
 0x3ce   :  { %1257 = vmatprep.mubr.bf16.mxu0 %v2684_v49 }
 0x3d5   :  { %1258 = vmatmul.mubr.bf16.gmra.mrb[92].mxu0 %v3234_v15 }
 0x430   :  { %v1946_v20 = vpop.f32.mrb[32].mxu0 }
 0x431   :  { %v1947_v22 = vpop.f32.mrb[33].mxu0 }
 0x432   :  { %v1948_v23 = vadd.f32 %v1947_v22, %v1946_v20  ;;  %v1949_v24 = vpop.f32.mrb[34].mxu0 }
 0x433   :  { %v1950_v27 = vpop.f32.mrb[35].mxu0 }
 0x434   :  { %v1140_v29 = vadd.f32 %v1948_v23, %v2806_v21  ;;  %v1951_v31 = vadd.f32 %v1950_v27, %v1949_v24 }
 0x436   :  { %v1143_v32 = vadd.f32 %v1951_v31, %v2806_v21  ;;  %v2813_v33 = vsel %vm1268_vm0, %v1140_v29, -inf }
 0x437   :  { %1301 = vmax.xlane.f32.xlu0 %v2813_v33 }
 0x438   :  { %v1952_v34 = vpop.f32.mrb[36].mxu0  ;;  %v2818_v37 = vsel %vm1268_vm0, %v1143_v32, -inf }
 0x439   :  { %v1953_v35 = vpop.f32.mrb[37].mxu0 }
 0x43a   :  { %v1954_v36 = vadd.f32 %v1953_v35, %v1952_v34  ;;  %v1955_v38 = vpop.f32.mrb[38].mxu0 }
 0x43b   :  { %1303 = vmax.xlane.f32.xlu0 %v2818_v37  ;;  %v1956_v39 = vpop.f32.mrb[39].mxu0 }
 0x43c   :  { %v1148_v40 = vadd.f32 %v1954_v36, %v2806_v21  ;;  %v1957_v41 = vadd.f32 %v1956_v39, %v1955_v38 }
 0x43e   :  { %v1151_v42 = vadd.f32 %v1957_v41, %v2806_v21  ;;  %v2825_v43 = vsel %vm1268_vm0, %v1148_v40, -inf }
 0x43f   :  { %1305 = vmax.xlane.f32.xlu1 %v2825_v43 }
 0x440   :  { %v1958_v44 = vpop.f32.mrb[40].mxu0  ;;  %v2830_v48 = vsel %vm1268_vm0, %v1151_v42, -inf }
 0x441   :  { %v1959_v45 = vpop.f32.mrb[41].mxu0 }
 0x442   :  { %v1960_v46 = vadd.f32 %v1959_v45, %v1958_v44  ;;  %v1961_v47 = vpop.f32.mrb[42].mxu0 }
 0x443   :  { %v1962_v49 = vpop.f32.mrb[43].mxu0  ;;  %1307 = vmax.xlane.f32.xlu1 %v2830_v48 }
 0x444   :  { %v1156_v50 = vadd.f32 %v1960_v46, %v2806_v21  ;;  %v1963_v2 = vadd.f32 %v1962_v49, %v1961_v47 }
 0x446   :  { %v1159_v4 = vadd.f32 %v1963_v2, %v2806_v21  ;;  %v2837_v8 = vsel %vm1268_vm0, %v1156_v50, -inf }
 0x447   :  { %1309 = vmax.xlane.f32.xlu0 %v2837_v8 }
 0x448   :  { %v1964_v9 = vpop.f32.mrb[44].mxu0  ;;  %v2842_v7 = vsel %vm1268_vm0, %v1159_v4, -inf }
 0x449   :  { %v1965_v51 = vpop.f32.mrb[45].mxu0  ;;  %1311 = vmax.xlane.f32.xlu1 %v2842_v7 }
 0x44a   :  { %v1966_v0 = vadd.f32 %v1965_v51, %v1964_v9  ;;  %v1967_v14 = vpop.f32.mrb[46].mxu0 }
 0x44b   :  { %v1968_v26 = vpop.f32.mrb[47].mxu0 }
 0x44c   :  { %v1164_v62 = vadd.f32 %v1966_v0, %v2806_v21  ;;  %v1969_v3 = vadd.f32 %v1968_v26, %v1967_v14 }
 0x44e   :  { %v1167_v25 = vadd.f32 %v1969_v3, %v2806_v21  ;;  %v2849_v54 = vsel %vm1268_vm0, %v1164_v62, -inf }
 0x44f   :  { %1313 = vmax.xlane.f32.xlu0 %v2849_v54 }
 0x450   :  { %v1970_v13 = vpop.f32.mrb[48].mxu0  ;;  %v2854_v1 = vsel %vm1268_vm0, %v1167_v25, -inf }
 0x451   :  { %v1971_v11 = vpop.f32.mrb[49].mxu0  ;;  %1315 = vmax.xlane.f32.xlu1 %v2854_v1 }
 0x452   :  { %v1972_v12 = vadd.f32 %v1971_v11, %v1970_v13  ;;  %v1973_v17 = vpop.f32.mrb[50].mxu0 }
 0x453   :  { %v1974_v28 = vpop.f32.mrb[51].mxu0 }
 0x454   :  { %v1172_v30 = vadd.f32 %v1972_v12, %v2806_v21  ;;  %v1975_v16 = vadd.f32 %v1974_v28, %v1973_v17 }
 0x456   :  { %v1175_v55 = vadd.f32 %v1975_v16, %v2806_v21  ;;  %v2861_v52 = vsel %vm1268_vm0, %v1172_v30, -inf }
 0x457   :  { %1317 = vmax.xlane.f32.xlu0 %v2861_v52 }
 0x458   :  { %v1976_v58 = vpop.f32.mrb[52].mxu0  ;;  %v2866_v59 = vsel %vm1268_vm0, %v1175_v55, -inf }
 0x459   :  { %v1977_v60 = vpop.f32.mrb[53].mxu0  ;;  %1319 = vmax.xlane.f32.xlu1 %v2866_v59 }
 0x45a   :  { %v1978_v61 = vadd.f32 %v1977_v60, %v1976_v58  ;;  %v1979_v5 = vpop.f32.mrb[54].mxu0 }
 0x45b   :  { %v1980_v53 = vpop.f32.mrb[55].mxu0 }
 0x45c   :  { %v1180_v57 = vadd.f32 %v1978_v61, %v2806_v21  ;;  %v1981_v63 = vadd.f32 %v1980_v53, %v1979_v5 }
 0x45e   :  { %v1183_v10 = vadd.f32 %v1981_v63, %v2806_v21  ;;  %v2873_v6 = vsel %vm1268_vm0, %v1180_v57, -inf }
 0x45f   :  { %1321 = vmax.xlane.f32.xlu0 %v2873_v6 }
 0x460   :  { %v1982_v56 = vpop.f32.mrb[56].mxu0  ;;  %v2878_v15 = vsel %vm1268_vm0, %v1183_v10, -inf }
 0x461   :  { %v1983_v18 = vpop.f32.mrb[57].mxu0  ;;  %1323 = vmax.xlane.f32.xlu1 %v2878_v15 }
 0x462   :  { %v1984_v20 = vadd.f32 %v1983_v18, %v1982_v56  ;;  %v1985_v22 = vpop.f32.mrb[58].mxu0 }
 0x463   :  { %v1986_v23 = vpop.f32.mrb[59].mxu0 }
 0x464   :  { %v1188_v24 = vadd.f32 %v1984_v20, %v2806_v21  ;;  %v1987_v27 = vadd.f32 %v1986_v23, %v1985_v22 }
 0x466   :  { %v1191_v29 = vadd.f32 %v1987_v27, %v2806_v21  ;;  %v2885_v31 = vsel %vm1268_vm0, %v1188_v24, -inf }
 0x467   :  { %1325 = vmax.xlane.f32.xlu0 %v2885_v31 }
 0x468   :  { %v1988_v32 = vpop.f32.mrb[60].mxu0  ;;  %v2890_v34 = vsel %vm1268_vm0, %v1191_v29, -inf }
 0x469   :  { %v1989_v35 = vpop.f32.mrb[61].mxu0  ;;  %1327 = vmax.xlane.f32.xlu1 %v2890_v34 }
 0x46a   :  { %v1990_v36 = vadd.f32 %v1989_v35, %v1988_v32  ;;  %v1991_v38 = vpop.f32.mrb[62].mxu0 }
 0x46b   :  { %v1992_v39 = vpop.f32.mrb[63].mxu0 }
 0x46c   :  { %v1196_v40 = vadd.f32 %v1990_v36, %v2806_v21  ;;  %v1993_v41 = vadd.f32 %v1992_v39, %v1991_v38 }
 0x46e   :  { %v1199_v42 = vadd.f32 %v1993_v41, %v2806_v21  ;;  %v2897_v44 = vsel %vm1268_vm0, %v1196_v40, -inf }
 0x46f   :  { %1329 = vmax.xlane.f32.xlu0 %v2897_v44 }
 0x470   :  { %v1994_v45 = vpop.f32.mrb[64].mxu0  ;;  %v2902_v46 = vsel %vm1268_vm0, %v1199_v42, -inf }
 0x471   :  { %v1995_v47 = vpop.f32.mrb[65].mxu0  ;;  %1331 = vmax.xlane.f32.xlu1 %v2902_v46 }
 0x472   :  { %v1996_v49 = vadd.f32 %v1995_v47, %v1994_v45  ;;  %v1997_v50 = vpop.f32.mrb[66].mxu0 }
 0x473   :  { %v1998_v2 = vpop.f32.mrb[67].mxu0 }
 0x474   :  { %v1204_v4 = vadd.f32 %v1996_v49, %v2806_v21  ;;  %v1999_v9 = vadd.f32 %v1998_v2, %v1997_v50 }
 0x476   :  { %v1207_v51 = vadd.f32 %v1999_v9, %v2806_v21  ;;  %v2909_v0 = vsel %vm1268_vm0, %v1204_v4, -inf }
 0x477   :  { %1333 = vmax.xlane.f32.xlu0 %v2909_v0 }
 0x478   :  { %v2000_v14 = vpop.f32.mrb[68].mxu0  ;;  %v2914_v26 = vsel %vm1268_vm0, %v1207_v51, -inf }
 0x479   :  { %v2001_v62 = vpop.f32.mrb[69].mxu0  ;;  %1335 = vmax.xlane.f32.xlu1 %v2914_v26 }
 0x47a   :  { %v2002_v3 = vadd.f32 %v2001_v62, %v2000_v14  ;;  %v2003_v25 = vpop.f32.mrb[70].mxu0 }
 0x47b   :  { %v2004_v13 = vpop.f32.mrb[71].mxu0 }
 0x47c   :  { %v1212_v11 = vadd.f32 %v2002_v3, %v2806_v21  ;;  %v2005_v12 = vadd.f32 %v2004_v13, %v2003_v25 }
 0x47e   :  { %v1215_v17 = vadd.f32 %v2005_v12, %v2806_v21  ;;  %v2921_v28 = vsel %vm1268_vm0, %v1212_v11, -inf }
 0x47f   :  { %1337 = vmax.xlane.f32.xlu0 %v2921_v28 }
 0x480   :  { %v2006_v30 = vpop.f32.mrb[72].mxu0  ;;  %v2926_v16 = vsel %vm1268_vm0, %v1215_v17, -inf }
 0x481   :  { %v2007_v55 = vpop.f32.mrb[73].mxu0  ;;  %1339 = vmax.xlane.f32.xlu1 %v2926_v16 }
 0x482   :  { %v2008_v58 = vadd.f32 %v2007_v55, %v2006_v30  ;;  %v2009_v60 = vpop.f32.mrb[74].mxu0 }
 0x483   :  { %v2010_v61 = vpop.f32.mrb[75].mxu0 }
 0x484   :  { %v1220_v5 = vadd.f32 %v2008_v58, %v2806_v21  ;;  %v2011_v53 = vadd.f32 %v2010_v61, %v2009_v60 }
 0x486   :  { %v1223_v57 = vadd.f32 %v2011_v53, %v2806_v21  ;;  %v2933_v63 = vsel %vm1268_vm0, %v1220_v5, -inf }
 0x487   :  { %3235 = vst [vmem:[#allocation15_spill] sm:$0xff] %v2933_v63  ;;  %1341 = vmax.xlane.f32.xlu0 %v2933_v63 }
 0x488   :  { %v2012_v10 = vpop.f32.mrb[76].mxu0  ;;  %v2938_v56 = vsel %vm1268_vm0, %v1223_v57, -inf }
 0x489   :  { %3236 = vst [vmem:[#allocation16_spill] sm:$0xff] %v2938_v56  ;;  %v2013_v18 = vpop.f32.mrb[77].mxu0  ;;  %1343 = vmax.xlane.f32.xlu1 %v2938_v56 }
 0x48a   :  { %v2014_v20 = vadd.f32 %v2013_v18, %v2012_v10  ;;  %v2015_v22 = vpop.f32.mrb[78].mxu0 }
 0x48b   :  { %v2016_v23 = vpop.f32.mrb[79].mxu0 }
 0x48c   :  { %v1228_v24 = vadd.f32 %v2014_v20, %v2806_v21  ;;  %v2017_v27 = vadd.f32 %v2016_v23, %v2015_v22 }
 0x48e   :  { %v1231_v29 = vadd.f32 %v2017_v27, %v2806_v21  ;;  %v2945_v32 = vsel %vm1268_vm0, %v1228_v24, -inf }
 0x48f   :  { %3237 = vst [vmem:[#allocation17_spill] sm:$0xff] %v2945_v32  ;;  %1345 = vmax.xlane.f32.xlu0 %v2945_v32 }
 0x490   :  { %v2018_v35 = vpop.f32.mrb[80].mxu0  ;;  %v2950_v36 = vsel %vm1268_vm0, %v1231_v29, -inf }
 0x491   :  { %3238 = vst [vmem:[#allocation18_spill] sm:$0xff] %v2950_v36  ;;  %v2019_v38 = vpop.f32.mrb[81].mxu0  ;;  %1347 = vmax.xlane.f32.xlu1 %v2950_v36 }
 0x492   :  { %v2020_v39 = vadd.f32 %v2019_v38, %v2018_v35  ;;  %v2021_v40 = vpop.f32.mrb[82].mxu0 }
 0x493   :  { %v2022_v41 = vpop.f32.mrb[83].mxu0 }
 0x494   :  { %v1236_v42 = vadd.f32 %v2020_v39, %v2806_v21  ;;  %v2023_v45 = vadd.f32 %v2022_v41, %v2021_v40 }
 0x496   :  { %v1239_v47 = vadd.f32 %v2023_v45, %v2806_v21  ;;  %v2957_v49 = vsel %vm1268_vm0, %v1236_v42, -inf }
 0x497   :  { %3239 = vst [vmem:[#allocation19_spill] sm:$0xff] %v2957_v49  ;;  %1349 = vmax.xlane.f32.xlu0 %v2957_v49 }
 0x498   :  { %v2024_v50 = vpop.f32.mrb[84].mxu0  ;;  %v2962_v2 = vsel %vm1268_vm0, %v1239_v47, -inf }
 0x499   :  { %3240 = vst [vmem:[#allocation20_spill] sm:$0xff] %v2962_v2  ;;  %v2025_v4 = vpop.f32.mrb[85].mxu0  ;;  %1351 = vmax.xlane.f32.xlu1 %v2962_v2 }
 0x49a   :  { %v2026_v9 = vadd.f32 %v2025_v4, %v2024_v50  ;;  %v2027_v51 = vpop.f32.mrb[86].mxu0 }
 0x49b   :  { %v2028_v14 = vpop.f32.mrb[87].mxu0 }
 0x49c   :  { %v1244_v62 = vadd.f32 %v2026_v9, %v2806_v21  ;;  %v2029_v3 = vadd.f32 %v2028_v14, %v2027_v51 }
 0x49e   :  { %v1247_v25 = vadd.f32 %v2029_v3, %v2806_v21  ;;  %v2969_v13 = vsel %vm1268_vm0, %v1244_v62, -inf }
 0x49f   :  { %3241 = vst [vmem:[#allocation21_spill] sm:$0xff] %v2969_v13  ;;  %1353 = vmax.xlane.f32.xlu0 %v2969_v13 }
 0x4a0   :  { %v2030_v11 = vpop.f32.mrb[88].mxu0  ;;  %v2974_v12 = vsel %vm1268_vm0, %v1247_v25, -inf }
 0x4a1   :  { %3242 = vst [vmem:[#allocation22_spill] sm:$0xff] %v2974_v12  ;;  %v2031_v17 = vpop.f32.mrb[89].mxu0  ;;  %1355 = vmax.xlane.f32.xlu1 %v2974_v12 }
 0x4a2   :  { %v2032_v30 = vadd.f32 %v2031_v17, %v2030_v11  ;;  %v2033_v55 = vpop.f32.mrb[90].mxu0 }
 0x4a3   :  { %v2034_v58 = vpop.f32.mrb[91].mxu0 }
 0x4a4   :  { %v1252_v60 = vadd.f32 %v2032_v30, %v2806_v21  ;;  %v2035_v61 = vadd.f32 %v2034_v58, %v2033_v55 }
 0x4a6   :  { %v1255_v5 = vadd.f32 %v2035_v61, %v2806_v21  ;;  %v2981_v53 = vsel %vm1268_vm0, %v1252_v60, -inf }
 0x4a7   :  { %3243 = vst [vmem:[#allocation23_spill] sm:$0xff] %v2981_v53  ;;  %1357 = vmax.xlane.f32.xlu0 %v2981_v53 }
 0x4a8   :  { %v2036_v57 = vpop.f32.mrb[92].mxu0  ;;  %v2986_v10 = vsel %vm1268_vm0, %v1255_v5, -inf }
 0x4a9   :  { %3244 = vst [vmem:[#allocation24_spill] sm:$0xff] %v2986_v10  ;;  %v2037_v18 = vpop.f32.mrb[93].mxu0  ;;  %1359 = vmax.xlane.f32.xlu1 %v2986_v10 }
 0x4aa   :  { %v2038_v20 = vadd.f32 %v2037_v18, %v2036_v57  ;;  %v2039_v22 = vpop.f32.mrb[94].mxu0 }
 0x4ab   :  { %v2040_v23 = vpop.f32.mrb[95].mxu0 }
 0x4ac   :  { %v1260_v24 = vadd.f32 %v2038_v20, %v2806_v21  ;;  %v2041_v27 = vadd.f32 %v2040_v23, %v2039_v22 }
 0x4ae   :  { %v1263_v29 = vadd.f32 %v2041_v27, %v2806_v21  ;;  %v2993_v35 = vsel %vm1268_vm0, %v1260_v24, -inf }
 0x4af   :  { %3245 = vst [vmem:[#allocation25_spill] sm:$0xff] %v2993_v35  ;;  %1361 = vmax.xlane.f32.xlu0 %v2993_v35 }
 0x4b0   :  { %v2998_v38 = vsel %vm1268_vm0, %v1263_v29, -inf }
 0x4b1   :  { %3246 = vst [vmem:[#allocation26_spill] sm:$0xff] %v2998_v38  ;;  %1363 = vmax.xlane.f32.xlu1 %v2998_v38 }
 0x4c4   :  { %v3001_v39 = vpop.xlane.xlu0 %1301 }
 0x4c5   :  { %v1365_v40 = vsub.f32 %v2813_v33, %v3001_v39 }
 0x4c7   :  { %v1397_v41 = vmul.f32 1.442695, %v1365_v40 }
 0x4c8   :  { %v3005_v42 = vpop.xlane.xlu0 %1303 }
 0x4c9   :  { %2243 = vpow2.f32 %v1397_v41  ;;  %v1366_v21 = vsub.f32 %v2818_v37, %v3005_v42 }
 0x4cb   :  { %v1399_v45 = vmul.f32 1.442695, %v1366_v21 }
 0x4cc   :  { %v3009_v47 = vpop.xlane.xlu1 %1305 }
 0x4cd   :  { %2245 = vpow2.f32 %v1399_v45  ;;  %v1367_v19 = vsub.f32 %v2825_v43, %v3009_v47 }
 0x4cf   :  { %v1401_v50 = vmul.f32 1.442695, %v1367_v19 }
 0x4d0   :  { %v3013_v4 = vpop.xlane.xlu1 %1307 }
 0x4d1   :  { %2247 = vpow2.f32 %v1401_v50  ;;  %v1368_v9 = vsub.f32 %v2830_v48, %v3013_v4 }
 0x4d3   :  { %v2244_v51 = vpop.eup %2243  ;;  %v1403_v14 = vmul.f32 1.442695, %v1368_v9 }
 0x4d4   :  { %1461 = vadd.xlane.f32.xlu0 %v2244_v51  ;;  %v3017_v62 = vpop.xlane.xlu0 %1309 }
 0x4d5   :  { %2249 = vpow2.f32 %v1403_v14  ;;  %v1369_v3 = vsub.f32 %v2837_v8, %v3017_v62 }
 0x4d6   :  { %v3021_v25 = vpop.xlane.xlu1 %1311 }
 0x4d7   :  { %v2246_v11 = vpop.eup %2245  ;;  %v1405_v17 = vmul.f32 1.442695, %v1369_v3  ;;  %v1370_v30 = vsub.f32 %v2842_v7, %v3021_v25 }
 0x4d8   :  { %1463 = vadd.xlane.f32.xlu1 %v2246_v11 }
 0x4d9   :  { %2251 = vpow2.f32 %v1405_v17  ;;  %v1407_v55 = vmul.f32 1.442695, %v1370_v30 }
 0x4db   :  { %v2248_v58 = vpop.eup %2247  ;;  %2253 = vpow2.f32 %v1407_v55 }
 0x4dc   :  { %1465 = vadd.xlane.f32.xlu0 %v2248_v58  ;;  %v3025_v60 = vpop.xlane.xlu0 %1313 }
 0x4dd   :  { %v1371_v61 = vsub.f32 %v2849_v54, %v3025_v60 }
 0x4de   :  { %v3029_v5 = vpop.xlane.xlu1 %1315 }
 0x4df   :  { %v2250_v57 = vpop.eup %2249  ;;  %v1409_v18 = vmul.f32 1.442695, %v1371_v61  ;;  %v1372_v20 = vsub.f32 %v2854_v1, %v3029_v5 }
 0x4e0   :  { %1467 = vadd.xlane.f32.xlu1 %v2250_v57 }
 0x4e1   :  { %2255 = vpow2.f32 %v1409_v18  ;;  %v1411_v22 = vmul.f32 1.442695, %v1372_v20 }
 0x4e3   :  { %v2252_v23 = vpop.eup %2251  ;;  %2257 = vpow2.f32 %v1411_v22 }
 0x4e4   :  { %1469 = vadd.xlane.f32.xlu0 %v2252_v23  ;;  %v3033_v24 = vpop.xlane.xlu0 %1317 }
 0x4e5   :  { %v2254_v27 = vpop.eup %2253  ;;  %v1373_v29 = vsub.f32 %v2861_v52, %v3033_v24 }
 0x4e6   :  { %v3037_v40 = vpop.xlane.xlu1 %1319  ;;  %1471 = vadd.xlane.f32.xlu1 %v2254_v27 }
 0x4e7   :  { %v1413_v41 = vmul.f32 1.442695, %v1373_v29  ;;  %v1374_v21 = vsub.f32 %v2866_v59, %v3037_v40 }
 0x4e9   :  { %2259 = vpow2.f32 %v1413_v41  ;;  %v1415_v45 = vmul.f32 1.442695, %v1374_v21 }
 0x4eb   :  { %v2256_v19 = vpop.eup %2255  ;;  %2261 = vpow2.f32 %v1415_v45 }
 0x4ec   :  { %1473 = vadd.xlane.f32.xlu0 %v2256_v19  ;;  %v3041_v50 = vpop.xlane.xlu0 %1321 }
 0x4ed   :  { %v2258_v9 = vpop.eup %2257  ;;  %v1375_v51 = vsub.f32 %v2873_v6, %v3041_v50 }
 0x4ee   :  { %v3045_v14 = vpop.xlane.xlu1 %1323  ;;  %1475 = vadd.xlane.f32.xlu1 %v2258_v9 }
 0x4ef   :  { %v1417_v3 = vmul.f32 1.442695, %v1375_v51  ;;  %v1376_v11 = vsub.f32 %v2878_v15, %v3045_v14 }
 0x4f1   :  { %2263 = vpow2.f32 %v1417_v3  ;;  %v1419_v17 = vmul.f32 1.442695, %v1376_v11 }
 0x4f3   :  { %v2260_v30 = vpop.eup %2259  ;;  %2265 = vpow2.f32 %v1419_v17 }
 0x4f4   :  { %1477 = vadd.xlane.f32.xlu0 %v2260_v30  ;;  %v3049_v55 = vpop.xlane.xlu0 %1325 }
 0x4f5   :  { %v2262_v58 = vpop.eup %2261  ;;  %v1377_v61 = vsub.f32 %v2885_v31, %v3049_v55 }
 0x4f6   :  { %v3053_v57 = vpop.xlane.xlu1 %1327  ;;  %1479 = vadd.xlane.f32.xlu1 %v2262_v58 }
 0x4f7   :  { %v1421_v18 = vmul.f32 1.442695, %v1377_v61  ;;  %v1378_v20 = vsub.f32 %v2890_v34, %v3053_v57 }
 0x4f9   :  { %2267 = vpow2.f32 %v1421_v18  ;;  %v1423_v22 = vmul.f32 1.442695, %v1378_v20 }
 0x4fb   :  { %v2264_v23 = vpop.eup %2263  ;;  %2269 = vpow2.f32 %v1423_v22 }
 0x4fc   :  { %1481 = vadd.xlane.f32.xlu0 %v2264_v23  ;;  %v3057_v27 = vpop.xlane.xlu0 %1329 }
 0x4fd   :  { %v2266_v29 = vpop.eup %2265  ;;  %v1379_v41 = vsub.f32 %v2897_v44, %v3057_v27 }
 0x4fe   :  { %v3061_v21 = vpop.xlane.xlu1 %1331  ;;  %1483 = vadd.xlane.f32.xlu1 %v2266_v29 }
 0x4ff   :  { %v1425_v45 = vmul.f32 1.442695, %v1379_v41  ;;  %v1380_v19 = vsub.f32 %v2902_v46, %v3061_v21 }
 0x501   :  { %2271 = vpow2.f32 %v1425_v45  ;;  %v1427_v9 = vmul.f32 1.442695, %v1380_v19 }
 0x503   :  { %v2268_v51 = vpop.eup %2267  ;;  %2273 = vpow2.f32 %v1427_v9 }
 0x504   :  { %1485 = vadd.xlane.f32.xlu0 %v2268_v51  ;;  %v3065_v3 = vpop.xlane.xlu0 %1333 }
 0x505   :  { %v2270_v11 = vpop.eup %2269  ;;  %v1381_v17 = vsub.f32 %v2909_v0, %v3065_v3 }
 0x506   :  { %v3069_v30 = vpop.xlane.xlu1 %1335  ;;  %1487 = vadd.xlane.f32.xlu1 %v2270_v11 }
 0x507   :  { %v1429_v58 = vmul.f32 1.442695, %v1381_v17  ;;  %v1382_v61 = vsub.f32 %v2914_v26, %v3069_v30 }
 0x509   :  { %2275 = vpow2.f32 %v1429_v58  ;;  %v1431_v18 = vmul.f32 1.442695, %v1382_v61 }
 0x50b   :  { %v2272_v20 = vpop.eup %2271  ;;  %2277 = vpow2.f32 %v1431_v18 }
 0x50c   :  { %1489 = vadd.xlane.f32.xlu0 %v2272_v20  ;;  %v3073_v22 = vpop.xlane.xlu0 %1337 }
 0x50d   :  { %v2274_v23 = vpop.eup %2273  ;;  %v1383_v29 = vsub.f32 %v2921_v28, %v3073_v22 }
 0x50e   :  { %v3077_v41 = vpop.xlane.xlu1 %1339  ;;  %1491 = vadd.xlane.f32.xlu1 %v2274_v23 }
 0x50f   :  { %v1433_v45 = vmul.f32 1.442695, %v1383_v29  ;;  %v1384_v19 = vsub.f32 %v2926_v16, %v3077_v41 }
 0x511   :  { %2279 = vpow2.f32 %v1433_v45  ;;  %v1435_v9 = vmul.f32 1.442695, %v1384_v19 }
 0x513   :  { %v2276_v51 = vpop.eup %2275  ;;  %2281 = vpow2.f32 %v1435_v9 }
 0x514   :  { %1493 = vadd.xlane.f32.xlu0 %v2276_v51  ;;  %v3081_v11 = vpop.xlane.xlu0 %1341 }
 0x515   :  { %v2278_v17 = vpop.eup %2277  ;;  %v1385_v58 = vsub.f32 %v2933_v63, %v3081_v11 }
 0x516   :  { %v3085_v61 = vpop.xlane.xlu1 %1343  ;;  %1495 = vadd.xlane.f32.xlu1 %v2278_v17 }
 0x517   :  { %v1437_v18 = vmul.f32 1.442695, %v1385_v58  ;;  %v1386_v20 = vsub.f32 %v2938_v56, %v3085_v61 }
 0x519   :  { %2283 = vpow2.f32 %v1437_v18  ;;  %v1439_v23 = vmul.f32 1.442695, %v1386_v20 }
 0x51b   :  { %v2280_v29 = vpop.eup %2279  ;;  %2285 = vpow2.f32 %v1439_v23 }
 0x51c   :  { %1497 = vadd.xlane.f32.xlu0 %v2280_v29  ;;  %v3089_v45 = vpop.xlane.xlu0 %1345 }
 0x51d   :  { %v2282_v19 = vpop.eup %2281  ;;  %v1387_v9 = vsub.f32 %v2945_v32, %v3089_v45 }
 0x51e   :  { %v3093_v51 = vpop.xlane.xlu1 %1347  ;;  %1499 = vadd.xlane.f32.xlu1 %v2282_v19 }
 0x51f   :  { %v1441_v63 = vmul.f32 1.442695, %v1387_v9  ;;  %v1388_v17 = vsub.f32 %v2950_v36, %v3093_v51 }
 0x521   :  { %2287 = vpow2.f32 %v1441_v63  ;;  %v1443_v58 = vmul.f32 1.442695, %v1388_v17 }
 0x523   :  { %v2284_v18 = vpop.eup %2283  ;;  %2289 = vpow2.f32 %v1443_v58 }
 0x524   :  { %1501 = vadd.xlane.f32.xlu0 %v2284_v18  ;;  %v3097_v20 = vpop.xlane.xlu0 %1349 }
 0x525   :  { %v2286_v23 = vpop.eup %2285  ;;  %v1389_v29 = vsub.f32 %v2957_v49, %v3097_v20 }
 0x526   :  { %v3101_v56 = vpop.xlane.xlu1 %1351  ;;  %1503 = vadd.xlane.f32.xlu1 %v2286_v23 }
 0x527   :  { %v1445_v32 = vmul.f32 1.442695, %v1389_v29  ;;  %v1390_v19 = vsub.f32 %v2962_v2, %v3101_v56 }
 0x529   :  { %2291 = vpow2.f32 %v1445_v32  ;;  %v1447_v9 = vmul.f32 1.442695, %v1390_v19 }
 0x52b   :  { %v2288_v63 = vpop.eup %2287  ;;  %2293 = vpow2.f32 %v1447_v9 }
 0x52c   :  { %1505 = vadd.xlane.f32.xlu0 %v2288_v63  ;;  %v3105_v17 = vpop.xlane.xlu0 %1353 }
 0x52d   :  { %v2290_v58 = vpop.eup %2289  ;;  %v1391_v18 = vsub.f32 %v2969_v13, %v3105_v17 }
 0x52e   :  { %v3109_v36 = vpop.xlane.xlu1 %1355  ;;  %1507 = vadd.xlane.f32.xlu1 %v2290_v58 }
 0x52f   :  { %v1449_v49 = vmul.f32 1.442695, %v1391_v18  ;;  %v1392_v23 = vsub.f32 %v2974_v12, %v3109_v36 }
 0x531   :  { %2295 = vpow2.f32 %v1449_v49  ;;  %v1451_v29 = vmul.f32 1.442695, %v1392_v23 }
 0x533   :  { %v2292_v32 = vpop.eup %2291  ;;  %2297 = vpow2.f32 %v1451_v29 }
 0x534   :  { %1509 = vadd.xlane.f32.xlu0 %v2292_v32  ;;  %v3113_v19 = vpop.xlane.xlu0 %1357 }
 0x535   :  { %v2294_v9 = vpop.eup %2293  ;;  %v1393_v63 = vsub.f32 %v2981_v53, %v3113_v19 }
 0x536   :  { %v3117_v2 = vpop.xlane.xlu1 %1359  ;;  %1511 = vadd.xlane.f32.xlu1 %v2294_v9 }
 0x537   :  { %v1453_v13 = vmul.f32 1.442695, %v1393_v63  ;;  %v1394_v58 = vsub.f32 %v2986_v10, %v3117_v2 }
 0x539   :  { %2299 = vpow2.f32 %v1453_v13  ;;  %v1455_v18 = vmul.f32 1.442695, %v1394_v58 }
 0x53b   :  { %v2296_v49 = vpop.eup %2295  ;;  %2301 = vpow2.f32 %v1455_v18 }
 0x53c   :  { %1513 = vadd.xlane.f32.xlu0 %v2296_v49  ;;  %v3121_v23 = vpop.xlane.xlu0 %1361 }
 0x53d   :  { %3247 = vst [vmem:[#allocation27_spill] sm:$0xff] %v3121_v23  ;;  %v2298_v29 = vpop.eup %2297  ;;  %v1395_v32 = vsub.f32 %v2993_v35, %v3121_v23 }
 0x53e   :  { %v3125_v12 = vpop.xlane.xlu1 %1363  ;;  %1515 = vadd.xlane.f32.xlu1 %v2298_v29 }
 0x53f   :  { %v1457_v53 = vmul.f32 1.442695, %v1395_v32  ;;  %v1396_v9 = vsub.f32 %v2998_v38, %v3125_v12 }
 0x541   :  { %2303 = vpow2.f32 %v1457_v53  ;;  %v1459_v63 = vmul.f32 1.442695, %v1396_v9 }
 0x543   :  { %v2300_v13 = vpop.eup %2299  ;;  %2305 = vpow2.f32 %v1459_v63 }
 0x544   :  { %1517 = vadd.xlane.f32.xlu0 %v2300_v13 }
 0x545   :  { %v2302_v58 = vpop.eup %2301 }
 0x546   :  { %1519 = vadd.xlane.f32.xlu1 %v2302_v58 }
 0x54b   :  { %v2304_v18 = vpop.eup %2303 }
 0x54c   :  { %1521 = vadd.xlane.f32.xlu0 %v2304_v18 }
 0x54d   :  { %v2306_v49 = vpop.eup %2305 }
 0x54e   :  { %1523 = vadd.xlane.f32.xlu1 %v2306_v49 }
 0x561   :  { %v1462_v10 = vpop.xlane.xlu0 %1461 }
 0x562   :  { %2307 = vlog2.f32 %v1462_v10 }
 0x565   :  { %v1464_v35 = vpop.xlane.xlu1 %1463 }
 0x566   :  { %2309 = vlog2.f32 %v1464_v35 }
 0x569   :  { %v1466_v29 = vpop.xlane.xlu0 %1465 }
 0x56a   :  { %2311 = vlog2.f32 %v1466_v29 }
 0x56c   :  { %v2308_v32 = vpop.eup %2307 }
 0x56d   :  { %v1526_v23 = vmul.f32 0.6931472, %v2308_v32  ;;  %v1468_v38 = vpop.xlane.xlu1 %1467 }
 0x56e   :  { %2313 = vlog2.f32 %v1468_v38 }
 0x56f   :  { %v1589_v53 = vadd.f32 %v1526_v23, %v3001_v39 }
 0x570   :  { %v2310_v9 = vpop.eup %2309 }
 0x571   :  { %v1621_v63 = vsub.f32 %v2813_v33, %v1589_v53  ;;  %v1528_v13 = vmul.f32 0.6931472, %v2310_v9  ;;  %v1470_v58 = vpop.xlane.xlu0 %1469 }
 0x572   :  { %2315 = vlog2.f32 %v1470_v58 }
 0x573   :  { %1653 = vst [vmem:[#allocation10] sm:$0xff] %v1621_v63  ;;  %v1590_v18 = vadd.f32 %v1528_v13, %v3005_v42  ;;  %v1472_v10 = vpop.xlane.xlu1 %1471 }
 0x574   :  { %v2312_v49 = vpop.eup %2311  ;;  %2317 = vlog2.f32 %v1472_v10 }
 0x575   :  { %v1622_v35 = vsub.f32 %v2818_v37, %v1590_v18  ;;  %v1530_v29 = vmul.f32 0.6931472, %v2312_v49 }
 0x577   :  { %1654 = vst [vmem:[#allocation10 + $0x8] sm:$0xff] %v1622_v35  ;;  %v1591_v38 = vadd.f32 %v1530_v29, %v3009_v47 }
 0x578   :  { %v2314_v32 = vpop.eup %2313 }
 0x579   :  { %v1623_v39 = vsub.f32 %v2825_v43, %v1591_v38  ;;  %v1532_v23 = vmul.f32 0.6931472, %v2314_v32  ;;  %v1474_v33 = vpop.xlane.xlu0 %1473 }
 0x57a   :  { %2319 = vlog2.f32 %v1474_v33 }
 0x57b   :  { %1655 = vst [vmem:[#allocation10 + $0x10] sm:$0xff] %v1623_v39  ;;  %v1592_v53 = vadd.f32 %v1532_v23, %v3013_v4  ;;  %v1476_v9 = vpop.xlane.xlu1 %1475 }
 0x57c   :  { %v2316_v42 = vpop.eup %2315  ;;  %2321 = vlog2.f32 %v1476_v9 }
 0x57d   :  { %v1624_v63 = vsub.f32 %v2830_v48, %v1592_v53  ;;  %v1534_v13 = vmul.f32 0.6931472, %v2316_v42 }
 0x57e   :  { %v2318_v37 = vpop.eup %2317 }
 0x57f   :  { %1656 = vst [vmem:[#allocation10 + $0x18] sm:$0xff] %v1624_v63  ;;  %v1593_v58 = vadd.f32 %v1534_v13, %v3017_v62  ;;  %v1536_v47 = vmul.f32 0.6931472, %v2318_v37 }
 0x581   :  { %v1625_v18 = vsub.f32 %v2837_v8, %v1593_v58  ;;  %v1594_v43 = vadd.f32 %v1536_v47, %v3021_v25  ;;  %v1478_v10 = vpop.xlane.xlu0 %1477 }
 0x582   :  { %2323 = vlog2.f32 %v1478_v10 }
 0x583   :  { %1657 = vst [vmem:[#allocation10 + $0x20] sm:$0xff] %v1625_v18  ;;  %v1626_v4 = vsub.f32 %v2842_v7, %v1594_v43  ;;  %v1480_v49 = vpop.xlane.xlu1 %1479 }
 0x584   :  { %v2320_v35 = vpop.eup %2319  ;;  %2325 = vlog2.f32 %v1480_v49 }
 0x585   :  { %1658 = vst [vmem:[#allocation10 + $0x28] sm:$0xff] %v1626_v4  ;;  %v1538_v48 = vmul.f32 0.6931472, %v2320_v35 }
 0x586   :  { %v2322_v29 = vpop.eup %2321 }
 0x587   :  { %v1595_v38 = vadd.f32 %v1538_v48, %v3025_v60  ;;  %v1540_v32 = vmul.f32 0.6931472, %v2322_v29 }
 0x589   :  { %v1627_v62 = vsub.f32 %v2849_v54, %v1595_v38  ;;  %v1596_v8 = vadd.f32 %v1540_v32, %v3029_v5  ;;  %v1482_v39 = vpop.xlane.xlu0 %1481 }
 0x58a   :  { %2327 = vlog2.f32 %v1482_v39 }
 0x58b   :  { %1659 = vst [vmem:[#allocation10 + $0x30] sm:$0xff] %v1627_v62  ;;  %v1628_v25 = vsub.f32 %v2854_v1, %v1596_v8  ;;  %v1484_v23 = vpop.xlane.xlu1 %1483 }
 0x58c   :  { %v2324_v7 = vpop.eup %2323  ;;  %2329 = vlog2.f32 %v1484_v23 }
 0x58d   :  { %1660 = vst [vmem:[#allocation10 + $0x38] sm:$0xff] %v1628_v25  ;;  %v1542_v33 = vmul.f32 0.6931472, %v2324_v7 }
 0x58e   :  { %v2326_v53 = vpop.eup %2325 }
 0x58f   :  { %v1597_v9 = vadd.f32 %v1542_v33, %v3033_v24  ;;  %v1544_v42 = vmul.f32 0.6931472, %v2326_v53 }
 0x591   :  { %v1629_v60 = vsub.f32 %v2861_v52, %v1597_v9  ;;  %v1598_v54 = vadd.f32 %v1544_v42, %v3037_v40  ;;  %v1486_v63 = vpop.xlane.xlu0 %1485 }
 0x592   :  { %2331 = vlog2.f32 %v1486_v63 }
 0x593   :  { %1661 = vst [vmem:[#allocation10 + $0x40] sm:$0xff] %v1629_v60  ;;  %v1630_v5 = vsub.f32 %v2866_v59, %v1598_v54  ;;  %v1488_v13 = vpop.xlane.xlu1 %1487 }
 0x594   :  { %v2328_v1 = vpop.eup %2327  ;;  %2333 = vlog2.f32 %v1488_v13 }
 0x595   :  { %1662 = vst [vmem:[#allocation10 + $0x48] sm:$0xff] %v1630_v5  ;;  %v1546_v37 = vmul.f32 0.6931472, %v2328_v1 }
 0x596   :  { %v2330_v58 = vpop.eup %2329 }
 0x597   :  { %v1599_v47 = vadd.f32 %v1546_v37, %v3041_v50  ;;  %v1548_v18 = vmul.f32 0.6931472, %v2330_v58 }
 0x599   :  { %v1631_v24 = vsub.f32 %v2873_v6, %v1599_v47  ;;  %v1600_v52 = vadd.f32 %v1548_v18, %v3045_v14  ;;  %v1490_v43 = vpop.xlane.xlu0 %1489 }
 0x59a   :  { %2335 = vlog2.f32 %v1490_v43 }
 0x59b   :  { %1663 = vst [vmem:[#allocation10 + $0x50] sm:$0xff] %v1631_v24  ;;  %v1632_v40 = vsub.f32 %v2878_v15, %v1600_v52  ;;  %v1492_v10 = vpop.xlane.xlu1 %1491 }
 0x59c   :  { %v2332_v59 = vpop.eup %2331  ;;  %2337 = vlog2.f32 %v1492_v10 }
 0x59d   :  { %1664 = vst [vmem:[#allocation10 + $0x58] sm:$0xff] %v1632_v40  ;;  %v1550_v4 = vmul.f32 0.6931472, %v2332_v59 }
 0x59e   :  { %v2334_v49 = vpop.eup %2333 }
 0x59f   :  { %v1601_v35 = vadd.f32 %v1550_v4, %v3049_v55  ;;  %v1552_v48 = vmul.f32 0.6931472, %v2334_v49 }
 0x5a1   :  { %v1633_v50 = vsub.f32 %v2885_v31, %v1601_v35  ;;  %v1602_v6 = vadd.f32 %v1552_v48, %v3053_v57  ;;  %v1494_v29 = vpop.xlane.xlu0 %1493 }
 0x5a2   :  { %2339 = vlog2.f32 %v1494_v29 }
 0x5a3   :  { %1665 = vst [vmem:[#allocation10 + $0x60] sm:$0xff] %v1633_v50  ;;  %v1634_v14 = vsub.f32 %v2890_v34, %v1602_v6  ;;  %v1496_v38 = vpop.xlane.xlu1 %1495 }
 0x5a4   :  { %v2336_v15 = vpop.eup %2335  ;;  %2341 = vlog2.f32 %v1496_v38 }
 0x5a5   :  { %1666 = vst [vmem:[#allocation10 + $0x68] sm:$0xff] %v1634_v14  ;;  %v1554_v32 = vmul.f32 0.6931472, %v2336_v15 }
 0x5a6   :  { %v2338_v62 = vpop.eup %2337 }
 0x5a7   :  { %v1603_v8 = vadd.f32 %v1554_v32, %v3057_v27  ;;  %v1556_v39 = vmul.f32 0.6931472, %v2338_v62 }
 0x5a9   :  { %v1635_v55 = vsub.f32 %v2897_v44, %v1603_v8  ;;  %v1604_v31 = vadd.f32 %v1556_v39, %v3061_v21  ;;  %v1498_v25 = vpop.xlane.xlu0 %1497 }
 0x5aa   :  { %2343 = vlog2.f32 %v1498_v25 }
 0x5ab   :  { %1667 = vst [vmem:[#allocation10 + $0x70] sm:$0xff] %v1635_v55  ;;  %v1636_v57 = vsub.f32 %v2902_v46, %v1604_v31  ;;  %v1500_v23 = vpop.xlane.xlu1 %1499 }
 0x5ac   :  { %v2340_v34 = vpop.eup %2339  ;;  %2345 = vlog2.f32 %v1500_v23 }
 0x5ad   :  { %1668 = vst [vmem:[#allocation10 + $0x78] sm:$0xff] %v1636_v57  ;;  %v1558_v7 = vmul.f32 0.6931472, %v2340_v34 }
 0x5ae   :  { %v2342_v33 = vpop.eup %2341 }
 0x5af   :  { %v1605_v53 = vadd.f32 %v1558_v7, %v3065_v3  ;;  %v1560_v9 = vmul.f32 0.6931472, %v2342_v33 }
 0x5b1   :  { %v1637_v27 = vsub.f32 %v2909_v0, %v1605_v53  ;;  %v1606_v44 = vadd.f32 %v1560_v9, %v3069_v30  ;;  %v1502_v42 = vpop.xlane.xlu0 %1501 }
 0x5b2   :  { %2347 = vlog2.f32 %v1502_v42 }
 0x5b3   :  { %1669 = vst [vmem:[#allocation10 + $0x80] sm:$0xff] %v1637_v27  ;;  %v1638_v21 = vsub.f32 %v2914_v26, %v1606_v44  ;;  %v1504_v60 = vpop.xlane.xlu1 %1503 }
 0x5b4   :  { %v2344_v46 = vpop.eup %2343  ;;  %2349 = vlog2.f32 %v1504_v60 }
 0x5b5   :  { %1670 = vst [vmem:[#allocation10 + $0x88] sm:$0xff] %v1638_v21  ;;  %v1562_v54 = vmul.f32 0.6931472, %v2344_v46 }
 0x5b6   :  { %v2346_v63 = vpop.eup %2345 }
 0x5b7   :  { %v1607_v5 = vadd.f32 %v1562_v54, %v3073_v22  ;;  %v1564_v13 = vmul.f32 0.6931472, %v2346_v63  ;;  %v3248_v22 = vld [vmem:[#allocation15_spill] sm:$0xff] }
 0x5b9   :  { %v1639_v3 = vsub.f32 %v2921_v28, %v1607_v5  ;;  %v1608_v0 = vadd.f32 %v1564_v13, %v3077_v41  ;;  %v1506_v1 = vpop.xlane.xlu0 %1505  ;;  %v3249_v41 = vld [vmem:[#allocation16_spill] sm:$0xff] }
 0x5ba   :  { %2351 = vlog2.f32 %v1506_v1 }
 0x5bb   :  { %1671 = vst [vmem:[#allocation10 + $0x90] sm:$0xff] %v1639_v3  ;;  %v1640_v30 = vsub.f32 %v2926_v16, %v1608_v0  ;;  %v1508_v37 = vpop.xlane.xlu1 %1507 }
 0x5bc   :  { %v2348_v26 = vpop.eup %2347  ;;  %2353 = vlog2.f32 %v1508_v37 }
 0x5bd   :  { %1672 = vst [vmem:[#allocation10 + $0x98] sm:$0xff] %v1640_v30  ;;  %v1566_v58 = vmul.f32 0.6931472, %v2348_v26  ;;  %v3258_v26 = vld [vmem:[#allocation27_spill] sm:$0xff] }
 0x5be   :  { %v2350_v47 = vpop.eup %2349 }
 0x5bf   :  { %v1609_v18 = vadd.f32 %v1566_v58, %v3081_v11  ;;  %v1568_v24 = vmul.f32 0.6931472, %v2350_v47  ;;  %v3250_v11 = vld [vmem:[#allocation17_spill] sm:$0xff] }
 0x5c1   :  { %v1641_v52 = vsub.f32 %v3248_v22, %v1609_v18  ;;  %v1610_v28 = vadd.f32 %v1568_v24, %v3085_v61  ;;  %v1510_v43 = vpop.xlane.xlu0 %1509  ;;  %v3251_v61 = vld [vmem:[#allocation18_spill] sm:$0xff]  ;;  %v3259_v18 = vld [vmem:[#allocation25_spill] sm:$0xff] }
 0x5c2   :  { %2355 = vlog2.f32 %v1510_v43  ;;  %v3260_v22 = vld [vmem:[#allocation26_spill] sm:$0xff] }
 0x5c3   :  { %1673 = vst [vmem:[#allocation10 + $0xa0] sm:$0xff] %v1641_v52  ;;  %v1642_v40 = vsub.f32 %v3249_v41, %v1610_v28  ;;  %v1512_v10 = vpop.xlane.xlu1 %1511 }
 0x5c4   :  { %v2352_v16 = vpop.eup %2351  ;;  %2357 = vlog2.f32 %v1512_v10 }
 0x5c5   :  { %1674 = vst [vmem:[#allocation10 + $0xa8] sm:$0xff] %v1642_v40  ;;  %v1570_v59 = vmul.f32 0.6931472, %v2352_v16 }
 0x5c6   :  { %v2354_v4 = vpop.eup %2353 }
 0x5c7   :  { %v1611_v49 = vadd.f32 %v1570_v59, %v3089_v45  ;;  %v1572_v35 = vmul.f32 0.6931472, %v2354_v4  ;;  %v3252_v45 = vld [vmem:[#allocation19_spill] sm:$0xff] }
 0x5c9   :  { %v1643_v48 = vsub.f32 %v3250_v11, %v1611_v49  ;;  %v1612_v50 = vadd.f32 %v1572_v35, %v3093_v51  ;;  %v1514_v6 = vpop.xlane.xlu0 %1513  ;;  %v3253_v51 = vld [vmem:[#allocation20_spill] sm:$0xff] }
 0x5ca   :  { %2359 = vlog2.f32 %v1514_v6 }
 0x5cb   :  { %1675 = vst [vmem:[#allocation10 + $0xb0] sm:$0xff] %v1643_v48  ;;  %v1644_v29 = vsub.f32 %v3251_v61, %v1612_v50  ;;  %v1516_v14 = vpop.xlane.xlu1 %1515 }
 0x5cc   :  { %v2356_v38 = vpop.eup %2355  ;;  %2361 = vlog2.f32 %v1516_v14 }
 0x5cd   :  { %1676 = vst [vmem:[#allocation10 + $0xb8] sm:$0xff] %v1644_v29  ;;  %v1574_v15 = vmul.f32 0.6931472, %v2356_v38 }
 0x5ce   :  { %v2358_v32 = vpop.eup %2357 }
 0x5cf   :  { %v1613_v62 = vadd.f32 %v1574_v15, %v3097_v20  ;;  %v1576_v8 = vmul.f32 0.6931472, %v2358_v32  ;;  %v3254_v20 = vld [vmem:[#allocation21_spill] sm:$0xff] }
 0x5d1   :  { %v1645_v39 = vsub.f32 %v3252_v45, %v1613_v62  ;;  %v1614_v55 = vadd.f32 %v1576_v8, %v3101_v56  ;;  %v1518_v31 = vpop.xlane.xlu0 %1517  ;;  %v3255_v56 = vld [vmem:[#allocation22_spill] sm:$0xff] }
 0x5d2   :  { %2363 = vlog2.f32 %v1518_v31 }
 0x5d3   :  { %1677 = vst [vmem:[#allocation10 + $0xc0] sm:$0xff] %v1645_v39  ;;  %v1646_v25 = vsub.f32 %v3253_v51, %v1614_v55  ;;  %v1520_v57 = vpop.xlane.xlu1 %1519 }
 0x5d4   :  { %v2360_v23 = vpop.eup %2359  ;;  %2365 = vlog2.f32 %v1520_v57 }
 0x5d5   :  { %1678 = vst [vmem:[#allocation10 + $0xc8] sm:$0xff] %v1646_v25  ;;  %v1578_v34 = vmul.f32 0.6931472, %v2360_v23 }
 0x5d6   :  { %v2362_v7 = vpop.eup %2361 }
 0x5d7   :  { %v1615_v33 = vadd.f32 %v1578_v34, %v3105_v17  ;;  %v1580_v53 = vmul.f32 0.6931472, %v2362_v7  ;;  %v3256_v17 = vld [vmem:[#allocation23_spill] sm:$0xff] }
 0x5d9   :  { %v1647_v9 = vsub.f32 %v3254_v20, %v1615_v33  ;;  %v1616_v27 = vadd.f32 %v1580_v53, %v3109_v36  ;;  %v1522_v44 = vpop.xlane.xlu0 %1521  ;;  %v3257_v36 = vld [vmem:[#allocation24_spill] sm:$0xff] }
 0x5da   :  { %2367 = vlog2.f32 %v1522_v44 }
 0x5db   :  { %1679 = vst [vmem:[#allocation10 + $0xd0] sm:$0xff] %v1647_v9  ;;  %v1648_v42 = vsub.f32 %v3255_v56, %v1616_v27  ;;  %v1524_v21 = vpop.xlane.xlu1 %1523 }
 0x5dc   :  { %v2364_v60 = vpop.eup %2363  ;;  %2369 = vlog2.f32 %v1524_v21 }
 0x5dd   :  { %1680 = vst [vmem:[#allocation10 + $0xd8] sm:$0xff] %v1648_v42  ;;  %v1582_v46 = vmul.f32 0.6931472, %v2364_v60 }
 0x5de   :  { %v2366_v54 = vpop.eup %2365 }
 0x5df   :  { %v1617_v63 = vadd.f32 %v1582_v46, %v3113_v19  ;;  %v1584_v5 = vmul.f32 0.6931472, %v2366_v54 }
 0x5e1   :  { %v1649_v13 = vsub.f32 %v3256_v17, %v1617_v63  ;;  %v1618_v3 = vadd.f32 %v1584_v5, %v3117_v2 }
 0x5e3   :  { %1681 = vst [vmem:[#allocation10 + $0xe0] sm:$0xff] %v1649_v13  ;;  %v1650_v0 = vsub.f32 %v3257_v36, %v1618_v3 }
 0x5e4   :  { %v2368_v1 = vpop.eup %2367 }
 0x5e5   :  { %1682 = vst [vmem:[#allocation10 + $0xe8] sm:$0xff] %v1650_v0  ;;  %v1586_v30 = vmul.f32 0.6931472, %v2368_v1 }
 0x5e6   :  { %v2370_v37 = vpop.eup %2369 }
 0x5e7   :  { %v1619_v58 = vadd.f32 %v1586_v30, %v3258_v26  ;;  %v1588_v47 = vmul.f32 0.6931472, %v2370_v37 }
 0x5e9   :  { %v1651_v24 = vsub.f32 %v3259_v18, %v1619_v58  ;;  %v1620_v19 = vadd.f32 %v1588_v47, %v3125_v12 }
 0x5eb   :  { %1683 = vst [vmem:[#allocation10 + $0xf0] sm:$0xff] %v1651_v24  ;;  %v1652_v52 = vsub.f32 %v3260_v22, %v1620_v19 }
 0x5ed   :  { %1684 = vst [vmem:[#allocation10 + $0xf8] sm:$0xff] %v1652_v52 }
 0x5ee   :  { %2470 = shalt.err (!%p2467_p8)
}
 0x5ef   :  { %s2471_s29 = scalar_lea.hbm %s3214_s6, 4096 }
 0x5f0   :  { %p2472_p9 = scmp.ne.s32.totalorder %s3214_s6, %s2471_s29  ;;  %p2475_p10 = scmp.lt.u32.totalorder %s2471_s29, %s3214_s6 }
 0x5f2   :  { %p2477_p11 = pnand %p2475_p10, %p2472_p9 }
 0x5f4   :  { %2480 = shalt.err (!%p2477_p11)
}
 0x5f5   :  { %1696 = dma.vmem_to_hbm [thread:$0]  %s1691_s25, 4096, %s3214_s6, [#allocation4], %s2493_s1, %s2493_s1, %s2494_s21  }
 0x5f6   :  { %2487 = dma.done.wait [#allocation4], 4096  }
 0x5f7   :  { %2488 = vsyncadd [#allocation4], 4294963200 }
 0x5f8   :  { %1700 = vsyncpa [#allocation3], 1 }
 0x5f9   :  { %1701 = vsyncpa [#allocation6], 1 }
 0x5fa   :  { %1702 = vsyncpa [#allocation9], 1 }
 0x5fb   :  { %1703 = vsyncpa [#allocation4], 1 }

</bundles_post_ra>
